<compile_context>
chip_gen: v7x
topology: tpu7x:2x2x1
jax: 0.10.0
libtpu: 0.0.40
codegen_flags: <defaults>
</compile_context>

<pallas_src>
import functools

import jax
import jax.numpy as jnp
from jax.experimental import pallas as pl
from jax.experimental.pallas import tpu as pltpu

LANE = 128


def _round_up(n, m):
    return ((n + m - 1) // m) * m


def _pick_tile(n, candidates):
    for c in candidates:
        if c <= n and n % c == 0:
            return c
    return n


def _vmem_capacity_bytes():
    try:
        info = pltpu.get_tpu_info()
        cap = getattr(info, "vmem_capacity_bytes", None)
        if cap:
            return int(cap)
    except Exception:
        pass
    return 64 * 1024 * 1024  # conservative (v7x per-TC VMEM)


# ==========================================================================
# Path 1: fully fused kernel (A resident in VMEM, no grid)
# ==========================================================================
def _fused_gnn_kernel(adj_ref, x_ref, wrel_ref, wroot_ref, b_ref, pool_ref,
                      wlin_ref, blin_ref, out_ref, *, out_channels,
                      residual_flags):
    a = adj_ref[...]                              # bf16 [npad, npad], loaded once
    h = x_ref[...]                                # bf16 [npad, cpad]
    for l in range(5):
        agg = jnp.dot(a, h, preferred_element_type=jnp.float32)        # A @ h
        out = jnp.dot(agg.astype(jnp.bfloat16), wrel_ref[l],
                      preferred_element_type=jnp.float32)
        out = out + jnp.dot(h, wroot_ref[l], preferred_element_type=jnp.float32)
        out = out + b_ref[l]                                            # [1, cpad]
        if residual_flags[l]:
            out = out + h.astype(jnp.float32)      # residual applied pre-ReLU
        h = jnp.maximum(out, 0.0).astype(jnp.bfloat16)

    # global_mean_pool (pool kept f32 for exact 1/|graph| weights) -> Linear
    pooled = jnp.dot(pool_ref[...], h.astype(jnp.float32),
                     preferred_element_type=jnp.float32)                # [gpad, cpad]
    logits = jnp.dot(pooled.astype(jnp.bfloat16), wlin_ref[...],
                     preferred_element_type=jnp.float32) + blin_ref[...]

    # Mask lane-padded (fake) output channels out of the softmax; exact divide.
    col = jax.lax.broadcasted_iota(jnp.int32, logits.shape, 1)
    logits = jnp.where(col < out_channels, logits, -1e30)
    m = jnp.max(logits, axis=1, keepdims=True)
    e = jnp.exp(logits - m)
    out_ref[...] = e / jnp.sum(e, axis=1, keepdims=True)


# ==========================================================================
# Path 2: streamed per-layer kernels (2-D (i, k) grid)
# ==========================================================================
def _graph_conv_kernel(a_ref, hk_ref, hrow_ref, wrel_ref, wroot_ref, b_ref,
                       out_ref, acc_ref, *, residual):
    k = pl.program_id(1)

    @pl.when(k == 0)
    def _():
        acc_ref[...] = jnp.zeros_like(acc_ref)

    # int8 adjacency -> bf16 right before the MXU dot (rides spare VPU slots).
    a = a_ref[...].astype(jnp.float32).astype(jnp.bfloat16)
    # Plain full-ref accumulate into a matmul-shaped f32 scratch (MRB-friendly
    # on v7x; no lane-sliced read-modify-write).
    acc_ref[...] += jnp.dot(a, hk_ref[...], preferred_element_type=jnp.float32)

    @pl.when(k == pl.num_programs(1) - 1)
    def _():
        hrow = hrow_ref[...]                       # bf16 [tm, cpad]
        out = jnp.dot(acc_ref[...].astype(jnp.bfloat16), wrel_ref[...],
                      preferred_element_type=jnp.float32)
        out = out + jnp.dot(hrow, wroot_ref[...], preferred_element_type=jnp.float32)
        out = out + b_ref[...]
        if residual:
            out = out + hrow.astype(jnp.float32)   # residual pre-ReLU
        out_ref[...] = jnp.maximum(out, 0.0).astype(out_ref.dtype)


def _graph_conv_streamed(h, adj_i8, wrel, wroot, b, *, residual, tm, tk,
                         vmem_limit):
    npad, cpad = h.shape
    grid = (npad // tm, npad // tk)
    # Deeper buffering on the dominant adjacency stream when there are enough
    # reduction steps to overlap (perf-review suggestion).
    a_spec_kwargs = {}
    if grid[1] >= 3:
        a_spec_kwargs["pipeline_mode"] = pl.Buffered(3)
    kernel = functools.partial(_graph_conv_kernel, residual=residual)
    return pl.pallas_call(
        kernel,
        out_shape=jax.ShapeDtypeStruct((npad, cpad), jnp.bfloat16),
        grid_spec=pltpu.PrefetchScalarGridSpec(
            num_scalar_prefetch=0,
            grid=grid,
            in_specs=[
                pl.BlockSpec((tm, tk), lambda i, k: (i, k), **a_spec_kwargs),
                pl.BlockSpec((tk, cpad), lambda i, k: (k, 0)),     # h (k slab)
                pl.BlockSpec((tm, cpad), lambda i, k: (i, 0)),     # h (row slab)
                pl.BlockSpec((cpad, cpad), lambda i, k: (0, 0)),   # W_rel
                pl.BlockSpec((cpad, cpad), lambda i, k: (0, 0)),   # W_root
                pl.BlockSpec((1, cpad), lambda i, k: (0, 0)),      # bias
            ],
            out_specs=pl.BlockSpec((tm, cpad), lambda i, k: (i, 0)),
            scratch_shapes=[pltpu.VMEM((tm, cpad), jnp.float32)],
        ),
        # i ("parallel") shards across TCs on megacore parts.
        # TODO(synk): on v7x, switch i to pltpu.CORE_PARALLEL if the profile
        # shows the grid running on a single TensorCore.
        compiler_params=pltpu.CompilerParams(
            dimension_semantics=("parallel", "arbitrary"),
            vmem_limit_bytes=vmem_limit),
    )(adj_i8, h, h, wrel, wroot, b)


def _pool_head_kernel(p_ref, h_ref, wlin_ref, blin_ref, out_ref, acc_ref,
                      *, out_channels):
    k = pl.program_id(0)

    @pl.when(k == 0)
    def _():
        acc_ref[...] = jnp.zeros_like(acc_ref)

    acc_ref[...] += jnp.dot(p_ref[...], h_ref[...].astype(jnp.float32),
                            preferred_element_type=jnp.float32)

    @pl.when(k == pl.num_programs(0) - 1)
    def _():
        logits = jnp.dot(acc_ref[...].astype(jnp.bfloat16), wlin_ref[...],
                         preferred_element_type=jnp.float32) + blin_ref[...]
        col = jax.lax.broadcasted_iota(jnp.int32, logits.shape, 1)
        logits = jnp.where(col < out_channels, logits, -1e30)
        m = jnp.max(logits, axis=1, keepdims=True)
        e = jnp.exp(logits - m)
        out_ref[...] = e / jnp.sum(e, axis=1, keepdims=True)   # exact divide


def _pool_head_streamed(h, pool, wlin, blin, out_channels, *, tk, vmem_limit):
    npad, cpad = h.shape
    gpad = pool.shape[0]
    grid = (npad // tk,)
    kernel = functools.partial(_pool_head_kernel, out_channels=out_channels)
    return pl.pallas_call(
        kernel,
        out_shape=jax.ShapeDtypeStruct((gpad, cpad), jnp.float32),
        grid_spec=pltpu.PrefetchScalarGridSpec(
            num_scalar_prefetch=0,
            grid=grid,
            in_specs=[
                pl.BlockSpec((gpad, tk), lambda k: (0, k)),      # pool tile (f32)
                pl.BlockSpec((tk, cpad), lambda k: (k, 0)),      # h tile
                pl.BlockSpec((cpad, cpad), lambda k: (0, 0)),    # W_lin
                pl.BlockSpec((1, cpad), lambda k: (0, 0)),       # b_lin
            ],
            out_specs=pl.BlockSpec((gpad, cpad), lambda k: (0, 0)),
            scratch_shapes=[pltpu.VMEM((gpad, cpad), jnp.float32)],
        ),
        compiler_params=pltpu.CompilerParams(
            dimension_semantics=("arbitrary",),
            vmem_limit_bytes=vmem_limit),
    )(pool, h, wlin, blin)


# ==========================================================================
# Full forward
# ==========================================================================
def gnn_forward(x, adj, pool, params, *, mode="auto"):
    """x: [N, C_in] f32, adj: [N, N] f32 (A[dst, src]), pool: [G, N] f32."""
    n, cin = x.shape
    g = pool.shape[0]
    hidden = params["wrel2"].shape[0]
    out_c = params["wlin"].shape[1]
    # The reference model computes x + conv5(x): requires hidden == out.
    assert hidden == out_c, "residual x + conv5(x) needs hidden == out channels"

    cpad = max(_round_up(cin, LANE), _round_up(hidden, LANE),
               _round_up(out_c, LANE))
    gpad = _round_up(g, 8)

    cap = _vmem_capacity_bytes()
    vmem_limit = min(int(cap * 0.8), 100 * 1024 * 1024)

    # Conservative VMEM estimate for the fused (A resident) path,
    # incl. pipelining margin and in-kernel f32 temporaries.
    npad_f = _round_up(n, LANE)
    est = (2 * npad_f * npad_f * 2            # adjacency (bf16) x2 margin
           + 8 * npad_f * cpad * 4            # activations / f32 temporaries
           + 2 * gpad * npad_f * 4            # pooling matrix (f32)
           + 5 * 4 * cpad * cpad * 2)         # per-layer weights (bf16)
    use_fused = (mode == "fused") or (mode == "auto" and est <= 0.6 * cap)
    if mode == "streamed":
        use_fused = False

    def pad2(a, r, c):
        return jnp.pad(a, ((0, r - a.shape[0]), (0, c - a.shape[1])))

    wrels, wroots, bs = [], [], []
    for i in range(1, 6):
        wrels.append(pad2(params[f"wrel{i}"], cpad, cpad).astype(jnp.bfloat16))
        wroots.append(pad2(params[f"wroot{i}"], cpad, cpad).astype(jnp.bfloat16))
        bs.append(pad2(params[f"brel{i}"], 1, cpad).astype(jnp.float32))
    wlin_p = pad2(params["wlin"], cpad, cpad).astype(jnp.bfloat16)
    blin_p = pad2(params["blin"], 1, cpad).astype(jnp.float32)

    residual_flags = (False, False, False, True, True)

    if use_fused:
        npad = npad_f
        x_p = pad2(x, npad, cpad).astype(jnp.bfloat16)
        adj_p = pad2(adj, npad, npad).astype(jnp.bfloat16)  # small counts exact
        pool_p = pad2(pool, gpad, npad).astype(jnp.float32)
        wrel_stack = jnp.stack(wrels)       # [5, cpad, cpad]
        wroot_stack = jnp.stack(wroots)     # [5, cpad, cpad]
        b_stack = jnp.stack(bs)             # [5, 1, cpad]
        kernel = functools.partial(_fused_gnn_kernel, out_channels=out_c,
                                   residual_flags=residual_flags)
        out = pl.pallas_call(
            kernel,
            out_shape=jax.ShapeDtypeStruct((gpad, cpad), jnp.float32),
            compiler_params=pltpu.CompilerParams(vmem_limit_bytes=vmem_limit),
        )(adj_p, x_p, wrel_stack, wroot_stack, b_stack, pool_p, wlin_p, blin_p)
    else:
        # Streamed tiles: big node-row tiles cut the h re-stream; reduction
        # axis k stays innermost.
        base = 512 if n > 512 else LANE
        npad = _round_up(n, base)
        tm = _pick_tile(npad, (512, 256, 128))
        tk = _pick_tile(npad, (1024, 512, 256, 128))
        x_p = pad2(x, npad, cpad).astype(jnp.bfloat16)
        # TODO(synk): int8 storage assumes edge multiplicity < 128 (true for
        # simple graphs); fp8 e4m3 would be the v7x-native choice.
        adj_p = pad2(adj, npad, npad).astype(jnp.int8)
        pool_p = pad2(pool, gpad, npad).astype(jnp.float32)

        h = x_p
        for wr, wo, b, res in zip(wrels, wroots, bs, residual_flags):
            h = _graph_conv_streamed(h, adj_p, wr, wo, b, residual=res,
                                     tm=tm, tk=tk, vmem_limit=vmem_limit)
        out = _pool_head_streamed(h, pool_p, wlin_p, blin_p, out_c,
                                  tk=tk, vmem_limit=vmem_limit)

    return out[:g, :out_c]


# ==========================================================================
# Pure-JAX reference (the spec) + param init
# ==========================================================================
def gnn_reference(x, adj, pool, params):
    def conv(h, i):
        agg = adj @ h
        return (agg @ params[f"wrel{i}"] + params[f"brel{i}"]
                + h @ params[f"wroot{i}"])
    h = jax.nn.relu(conv(x, 1))
    h = jax.nn.relu(conv(h, 2))
    h = jax.nn.relu(conv(h, 3))
    h = jax.nn.relu(h + conv(h, 4))
    h = jax.nn.relu(h + conv(h, 5))
    pooled = pool @ h
    logits = pooled @ params["wlin"] + params["blin"]
    return jax.nn.softmax(logits, axis=1)


def _uniform(key, shape, fan_in):
    bound = 1.0 / jnp.sqrt(jnp.float32(fan_in))
    return jax.random.uniform(key, shape, jnp.float32, -bound, bound)


def init_params(key, in_channels, hidden_channels, out_channels):
    dims = [
        (in_channels, hidden_channels),
        (hidden_channels, hidden_channels),
        (hidden_channels, hidden_channels),
        (hidden_channels, hidden_channels),
        (hidden_channels, out_channels),
    ]
    params = {}
    for i, (cin, cout) in enumerate(dims, start=1):
        key, k1, k2, k3 = jax.random.split(key, 4)
        params[f"wrel{i}"] = _uniform(k1, (cin, cout), cin)
        params[f"wroot{i}"] = _uniform(k2, (cin, cout), cin)
        params[f"brel{i}"] = _uniform(k3, (1, cout), cin)
    key, k1, k2 = jax.random.split(key, 3)
    params["wlin"] = _uniform(k1, (out_channels, out_channels), out_channels)
    params["blin"] = _uniform(k2, (1, out_channels), out_channels)
    return params


if __name__ == "__main__":
    # Small synthetic problem: 2 graphs x 8 nodes = 16 nodes total.
    in_channels, hidden_channels, out_channels = 8, 32, 32
    num_nodes, num_graphs = 16, 2
    num_edges = 40

    root = jax.random.PRNGKey(0)
    k_x, k_src, k_dst, k_params = jax.random.split(root, 4)

    x = jax.random.normal(k_x, (num_nodes, in_channels), jnp.float32)

    # Random edges, constrained within each graph (nodes 0-7 / 8-15).
    src = jax.random.randint(k_src, (num_edges,), 0, num_nodes // 2)
    dst = jax.random.randint(k_dst, (num_edges,), 0, num_nodes // 2)
    graph_of_edge = jnp.arange(num_edges) % num_graphs
    src = src + graph_of_edge * (num_nodes // 2)
    dst = dst + graph_of_edge * (num_nodes // 2)

    # Dense adjacency: A[dst, src] += 1 (messages flow src -> dst).
    adj = jnp.zeros((num_nodes, num_nodes), jnp.float32).at[dst, src].add(1.0)

    # batch vector -> mean-pool matrix P[g, n] = 1/|graph g|.
    batch = jnp.arange(num_nodes) // (num_nodes // num_graphs)
    onehot = (batch[None, :] == jnp.arange(num_graphs)[:, None]).astype(jnp.float32)
    pool = onehot / jnp.sum(onehot, axis=1, keepdims=True)

    params = init_params(k_params, in_channels, hidden_channels, out_channels)

    ref = gnn_reference(x, adj, pool, params)

    # Exercise BOTH paths (fused A-resident kernel and streamed tiled kernels).
    out_fused = gnn_forward(x, adj, pool, params, mode="fused")
    out_streamed = gnn_forward(x, adj, pool, params, mode="streamed")
    jax.block_until_ready((out_fused, out_streamed))

    assert out_fused.shape == (num_graphs, out_channels)
    assert out_streamed.shape == (num_graphs, out_channels)
    # softmax rows sum to 1 (exact divide)
    assert jnp.allclose(jnp.sum(out_fused, axis=1), 1.0, atol=1e-3)
    assert jnp.allclose(jnp.sum(out_streamed, axis=1), 1.0, atol=1e-3)
    # match the pure-JAX reference (bf16 MXU feeds -> loose absolute tol)
    assert jnp.allclose(out_fused, ref, atol=1e-2)
    assert jnp.allclose(out_streamed, ref, atol=1e-2)
    print("KERNEL_OK")
</pallas_src>

<mosaic_0001>
module attributes {stable_mosaic.version = 11 : i64} {
  func.func @_fused_gnn_kernel(%arg0: memref<128x128xbf16, #tpu.memory_space<vmem>>, %arg1: memref<128x128xbf16, #tpu.memory_space<vmem>>, %arg2: memref<5x128x128xbf16, #tpu.memory_space<vmem>>, %arg3: memref<5x128x128xbf16, #tpu.memory_space<vmem>>, %arg4: memref<5x1x128xf32, #tpu.memory_space<vmem>>, %arg5: memref<8x128xf32, #tpu.memory_space<vmem>>, %arg6: memref<128x128xbf16, #tpu.memory_space<vmem>>, %arg7: memref<1x128xf32, #tpu.memory_space<vmem>>, %arg8: memref<8x128xf32, #tpu.memory_space<vmem>>) attributes {dimension_semantics = [], scalar_prefetch = 0 : i64, scratch_operands = 0 : i64, tpu.core_type = #tpu.core_type<tc>} {
    %c0 = arith.constant 0 : index
    %c0_0 = arith.constant 0 : index
    %0 = vector.load %arg0[%c0, %c0_0] : memref<128x128xbf16, #tpu.memory_space<vmem>>, vector<128x128xbf16>
    %c0_1 = arith.constant 0 : index
    %c0_2 = arith.constant 0 : index
    %1 = vector.load %arg1[%c0_1, %c0_2] : memref<128x128xbf16, #tpu.memory_space<vmem>>, vector<128x128xbf16>
    %cst = arith.constant dense<0.000000e+00> : vector<128x128xf32>
    %2 = tpu.matmul %0, %1, %cst {dimension_numbers = #tpu.dot_dimension_numbers<[1], [0], [0], [1], [0, 0, 1, 1], [], []>} : vector<128x128xbf16>, vector<128x128xbf16>, vector<128x128xf32> -> vector<128x128xf32>
    %3 = arith.truncf %2 : vector<128x128xf32> to vector<128x128xbf16>
    %c0_3 = arith.constant 0 : index
    %c0_4 = arith.constant 0 : index
    %c0_5 = arith.constant 0 : index
    %4 = vector.load %arg2[%c0_3, %c0_4, %c0_5] : memref<5x128x128xbf16, #tpu.memory_space<vmem>>, vector<1x128x128xbf16>
    %5 = vector.shape_cast %4 : vector<1x128x128xbf16> to vector<128x128xbf16>
    %cst_6 = arith.constant dense<0.000000e+00> : vector<128x128xf32>
    %6 = tpu.matmul %3, %5, %cst_6 {dimension_numbers = #tpu.dot_dimension_numbers<[1], [0], [0], [1], [0, 0, 1, 1], [], []>} : vector<128x128xbf16>, vector<128x128xbf16>, vector<128x128xf32> -> vector<128x128xf32>
    %c0_7 = arith.constant 0 : index
    %c0_8 = arith.constant 0 : index
    %c0_9 = arith.constant 0 : index
    %7 = vector.load %arg3[%c0_7, %c0_8, %c0_9] : memref<5x128x128xbf16, #tpu.memory_space<vmem>>, vector<1x128x128xbf16>
    %8 = vector.shape_cast %7 : vector<1x128x128xbf16> to vector<128x128xbf16>
    %cst_10 = arith.constant dense<0.000000e+00> : vector<128x128xf32>
    %9 = tpu.matmul %1, %8, %cst_10 {dimension_numbers = #tpu.dot_dimension_numbers<[1], [0], [0], [1], [0, 0, 1, 1], [], []>} : vector<128x128xbf16>, vector<128x128xbf16>, vector<128x128xf32> -> vector<128x128xf32>
    %10 = arith.addf %6, %9 : vector<128x128xf32>
    %c0_11 = arith.constant 0 : index
    %c0_12 = arith.constant 0 : index
    %c0_13 = arith.constant 0 : index
    %11 = vector.load %arg4[%c0_11, %c0_12, %c0_13] : memref<5x1x128xf32, #tpu.memory_space<vmem>>, vector<1x1x128xf32>
    %12 = vector.shape_cast %11 : vector<1x1x128xf32> to vector<1x128xf32>
    %13 = vector.broadcast %12 : vector<1x128xf32> to vector<128x128xf32>
    %14 = arith.addf %10, %13 : vector<128x128xf32>
    %cst_14 = arith.constant 0.000000e+00 : f32
    %15 = vector.broadcast %cst_14 : f32 to vector<128x128xf32>
    %16 = arith.maximumf %14, %15 : vector<128x128xf32>
    %17 = arith.truncf %16 : vector<128x128xf32> to vector<128x128xbf16>
    %cst_15 = arith.constant dense<0.000000e+00> : vector<128x128xf32>
    %18 = tpu.matmul %0, %17, %cst_15 {dimension_numbers = #tpu.dot_dimension_numbers<[1], [0], [0], [1], [0, 0, 1, 1], [], []>} : vector<128x128xbf16>, vector<128x128xbf16>, vector<128x128xf32> -> vector<128x128xf32>
    %19 = arith.truncf %18 : vector<128x128xf32> to vector<128x128xbf16>
    %c1 = arith.constant 1 : index
    %c0_16 = arith.constant 0 : index
    %c0_17 = arith.constant 0 : index
    %20 = vector.load %arg2[%c1, %c0_16, %c0_17] : memref<5x128x128xbf16, #tpu.memory_space<vmem>>, vector<1x128x128xbf16>
    %21 = vector.shape_cast %20 : vector<1x128x128xbf16> to vector<128x128xbf16>
    %cst_18 = arith.constant dense<0.000000e+00> : vector<128x128xf32>
    %22 = tpu.matmul %19, %21, %cst_18 {dimension_numbers = #tpu.dot_dimension_numbers<[1], [0], [0], [1], [0, 0, 1, 1], [], []>} : vector<128x128xbf16>, vector<128x128xbf16>, vector<128x128xf32> -> vector<128x128xf32>
    %c1_19 = arith.constant 1 : index
    %c0_20 = arith.constant 0 : index
    %c0_21 = arith.constant 0 : index
    %23 = vector.load %arg3[%c1_19, %c0_20, %c0_21] : memref<5x128x128xbf16, #tpu.memory_space<vmem>>, vector<1x128x128xbf16>
    %24 = vector.shape_cast %23 : vector<1x128x128xbf16> to vector<128x128xbf16>
    %cst_22 = arith.constant dense<0.000000e+00> : vector<128x128xf32>
    %25 = tpu.matmul %17, %24, %cst_22 {dimension_numbers = #tpu.dot_dimension_numbers<[1], [0], [0], [1], [0, 0, 1, 1], [], []>} : vector<128x128xbf16>, vector<128x128xbf16>, vector<128x128xf32> -> vector<128x128xf32>
    %26 = arith.addf %22, %25 : vector<128x128xf32>
    %c1_23 = arith.constant 1 : index
    %c0_24 = arith.constant 0 : index
    %c0_25 = arith.constant 0 : index
    %27 = vector.load %arg4[%c1_23, %c0_24, %c0_25] : memref<5x1x128xf32, #tpu.memory_space<vmem>>, vector<1x1x128xf32>
    %28 = vector.shape_cast %27 : vector<1x1x128xf32> to vector<1x128xf32>
    %29 = vector.broadcast %28 : vector<1x128xf32> to vector<128x128xf32>
    %30 = arith.addf %26, %29 : vector<128x128xf32>
    %cst_26 = arith.constant 0.000000e+00 : f32
    %31 = vector.broadcast %cst_26 : f32 to vector<128x128xf32>
    %32 = arith.maximumf %30, %31 : vector<128x128xf32>
    %33 = arith.truncf %32 : vector<128x128xf32> to vector<128x128xbf16>
    %cst_27 = arith.constant dense<0.000000e+00> : vector<128x128xf32>
    %34 = tpu.matmul %0, %33, %cst_27 {dimension_numbers = #tpu.dot_dimension_numbers<[1], [0], [0], [1], [0, 0, 1, 1], [], []>} : vector<128x128xbf16>, vector<128x128xbf16>, vector<128x128xf32> -> vector<128x128xf32>
    %35 = arith.truncf %34 : vector<128x128xf32> to vector<128x128xbf16>
    %c2 = arith.constant 2 : index
    %c0_28 = arith.constant 0 : index
    %c0_29 = arith.constant 0 : index
    %36 = vector.load %arg2[%c2, %c0_28, %c0_29] : memref<5x128x128xbf16, #tpu.memory_space<vmem>>, vector<1x128x128xbf16>
    %37 = vector.shape_cast %36 : vector<1x128x128xbf16> to vector<128x128xbf16>
    %cst_30 = arith.constant dense<0.000000e+00> : vector<128x128xf32>
    %38 = tpu.matmul %35, %37, %cst_30 {dimension_numbers = #tpu.dot_dimension_numbers<[1], [0], [0], [1], [0, 0, 1, 1], [], []>} : vector<128x128xbf16>, vector<128x128xbf16>, vector<128x128xf32> -> vector<128x128xf32>
    %c2_31 = arith.constant 2 : index
    %c0_32 = arith.constant 0 : index
    %c0_33 = arith.constant 0 : index
    %39 = vector.load %arg3[%c2_31, %c0_32, %c0_33] : memref<5x128x128xbf16, #tpu.memory_space<vmem>>, vector<1x128x128xbf16>
    %40 = vector.shape_cast %39 : vector<1x128x128xbf16> to vector<128x128xbf16>
    %cst_34 = arith.constant dense<0.000000e+00> : vector<128x128xf32>
    %41 = tpu.matmul %33, %40, %cst_34 {dimension_numbers = #tpu.dot_dimension_numbers<[1], [0], [0], [1], [0, 0, 1, 1], [], []>} : vector<128x128xbf16>, vector<128x128xbf16>, vector<128x128xf32> -> vector<128x128xf32>
    %42 = arith.addf %38, %41 : vector<128x128xf32>
    %c2_35 = arith.constant 2 : index
    %c0_36 = arith.constant 0 : index
    %c0_37 = arith.constant 0 : index
    %43 = vector.load %arg4[%c2_35, %c0_36, %c0_37] : memref<5x1x128xf32, #tpu.memory_space<vmem>>, vector<1x1x128xf32>
    %44 = vector.shape_cast %43 : vector<1x1x128xf32> to vector<1x128xf32>
    %45 = vector.broadcast %44 : vector<1x128xf32> to vector<128x128xf32>
    %46 = arith.addf %42, %45 : vector<128x128xf32>
    %cst_38 = arith.constant 0.000000e+00 : f32
    %47 = vector.broadcast %cst_38 : f32 to vector<128x128xf32>
    %48 = arith.maximumf %46, %47 : vector<128x128xf32>
    %49 = arith.truncf %48 : vector<128x128xf32> to vector<128x128xbf16>
    %cst_39 = arith.constant dense<0.000000e+00> : vector<128x128xf32>
    %50 = tpu.matmul %0, %49, %cst_39 {dimension_numbers = #tpu.dot_dimension_numbers<[1], [0], [0], [1], [0, 0, 1, 1], [], []>} : vector<128x128xbf16>, vector<128x128xbf16>, vector<128x128xf32> -> vector<128x128xf32>
    %51 = arith.truncf %50 : vector<128x128xf32> to vector<128x128xbf16>
    %c3 = arith.constant 3 : index
    %c0_40 = arith.constant 0 : index
    %c0_41 = arith.constant 0 : index
    %52 = vector.load %arg2[%c3, %c0_40, %c0_41] : memref<5x128x128xbf16, #tpu.memory_space<vmem>>, vector<1x128x128xbf16>
    %53 = vector.shape_cast %52 : vector<1x128x128xbf16> to vector<128x128xbf16>
    %cst_42 = arith.constant dense<0.000000e+00> : vector<128x128xf32>
    %54 = tpu.matmul %51, %53, %cst_42 {dimension_numbers = #tpu.dot_dimension_numbers<[1], [0], [0], [1], [0, 0, 1, 1], [], []>} : vector<128x128xbf16>, vector<128x128xbf16>, vector<128x128xf32> -> vector<128x128xf32>
    %c3_43 = arith.constant 3 : index
    %c0_44 = arith.constant 0 : index
    %c0_45 = arith.constant 0 : index
    %55 = vector.load %arg3[%c3_43, %c0_44, %c0_45] : memref<5x128x128xbf16, #tpu.memory_space<vmem>>, vector<1x128x128xbf16>
    %56 = vector.shape_cast %55 : vector<1x128x128xbf16> to vector<128x128xbf16>
    %cst_46 = arith.constant dense<0.000000e+00> : vector<128x128xf32>
    %57 = tpu.matmul %49, %56, %cst_46 {dimension_numbers = #tpu.dot_dimension_numbers<[1], [0], [0], [1], [0, 0, 1, 1], [], []>} : vector<128x128xbf16>, vector<128x128xbf16>, vector<128x128xf32> -> vector<128x128xf32>
    %58 = arith.addf %54, %57 : vector<128x128xf32>
    %c3_47 = arith.constant 3 : index
    %c0_48 = arith.constant 0 : index
    %c0_49 = arith.constant 0 : index
    %59 = vector.load %arg4[%c3_47, %c0_48, %c0_49] : memref<5x1x128xf32, #tpu.memory_space<vmem>>, vector<1x1x128xf32>
    %60 = vector.shape_cast %59 : vector<1x1x128xf32> to vector<1x128xf32>
    %61 = vector.broadcast %60 : vector<1x128xf32> to vector<128x128xf32>
    %62 = arith.addf %58, %61 : vector<128x128xf32>
    %63 = arith.extf %49 : vector<128x128xbf16> to vector<128x128xf32>
    %64 = arith.addf %62, %63 : vector<128x128xf32>
    %cst_50 = arith.constant 0.000000e+00 : f32
    %65 = vector.broadcast %cst_50 : f32 to vector<128x128xf32>
    %66 = arith.maximumf %64, %65 : vector<128x128xf32>
    %67 = arith.truncf %66 : vector<128x128xf32> to vector<128x128xbf16>
    %cst_51 = arith.constant dense<0.000000e+00> : vector<128x128xf32>
    %68 = tpu.matmul %0, %67, %cst_51 {dimension_numbers = #tpu.dot_dimension_numbers<[1], [0], [0], [1], [0, 0, 1, 1], [], []>} : vector<128x128xbf16>, vector<128x128xbf16>, vector<128x128xf32> -> vector<128x128xf32>
    %69 = arith.truncf %68 : vector<128x128xf32> to vector<128x128xbf16>
    %c4 = arith.constant 4 : index
    %c0_52 = arith.constant 0 : index
    %c0_53 = arith.constant 0 : index
    %70 = vector.load %arg2[%c4, %c0_52, %c0_53] : memref<5x128x128xbf16, #tpu.memory_space<vmem>>, vector<1x128x128xbf16>
    %71 = vector.shape_cast %70 : vector<1x128x128xbf16> to vector<128x128xbf16>
    %cst_54 = arith.constant dense<0.000000e+00> : vector<128x128xf32>
    %72 = tpu.matmul %69, %71, %cst_54 {dimension_numbers = #tpu.dot_dimension_numbers<[1], [0], [0], [1], [0, 0, 1, 1], [], []>} : vector<128x128xbf16>, vector<128x128xbf16>, vector<128x128xf32> -> vector<128x128xf32>
    %c4_55 = arith.constant 4 : index
    %c0_56 = arith.constant 0 : index
    %c0_57 = arith.constant 0 : index
    %73 = vector.load %arg3[%c4_55, %c0_56, %c0_57] : memref<5x128x128xbf16, #tpu.memory_space<vmem>>, vector<1x128x128xbf16>
    %74 = vector.shape_cast %73 : vector<1x128x128xbf16> to vector<128x128xbf16>
    %cst_58 = arith.constant dense<0.000000e+00> : vector<128x128xf32>
    %75 = tpu.matmul %67, %74, %cst_58 {dimension_numbers = #tpu.dot_dimension_numbers<[1], [0], [0], [1], [0, 0, 1, 1], [], []>} : vector<128x128xbf16>, vector<128x128xbf16>, vector<128x128xf32> -> vector<128x128xf32>
    %76 = arith.addf %72, %75 : vector<128x128xf32>
    %c4_59 = arith.constant 4 : index
    %c0_60 = arith.constant 0 : index
    %c0_61 = arith.constant 0 : index
    %77 = vector.load %arg4[%c4_59, %c0_60, %c0_61] : memref<5x1x128xf32, #tpu.memory_space<vmem>>, vector<1x1x128xf32>
    %78 = vector.shape_cast %77 : vector<1x1x128xf32> to vector<1x128xf32>
    %79 = vector.broadcast %78 : vector<1x128xf32> to vector<128x128xf32>
    %80 = arith.addf %76, %79 : vector<128x128xf32>
    %81 = arith.extf %67 : vector<128x128xbf16> to vector<128x128xf32>
    %82 = arith.addf %80, %81 : vector<128x128xf32>
    %cst_62 = arith.constant 0.000000e+00 : f32
    %83 = vector.broadcast %cst_62 : f32 to vector<128x128xf32>
    %84 = arith.maximumf %82, %83 : vector<128x128xf32>
    %85 = arith.truncf %84 : vector<128x128xf32> to vector<128x128xbf16>
    %c0_63 = arith.constant 0 : index
    %c0_64 = arith.constant 0 : index
    %86 = vector.load %arg5[%c0_63, %c0_64] : memref<8x128xf32, #tpu.memory_space<vmem>>, vector<8x128xf32>
    %87 = arith.extf %85 : vector<128x128xbf16> to vector<128x128xf32>
    %cst_65 = arith.constant dense<0.000000e+00> : vector<8x128xf32>
    %88 = tpu.matmul %86, %87, %cst_65 {dimension_numbers = #tpu.dot_dimension_numbers<[1], [0], [0], [1], [0, 0, 1, 1], [], []>} : vector<8x128xf32>, vector<128x128xf32>, vector<8x128xf32> -> vector<8x128xf32>
    %89 = arith.truncf %88 : vector<8x128xf32> to vector<8x128xbf16>
    %c0_66 = arith.constant 0 : index
    %c0_67 = arith.constant 0 : index
    %90 = vector.load %arg6[%c0_66, %c0_67] : memref<128x128xbf16, #tpu.memory_space<vmem>>, vector<128x128xbf16>
    %cst_68 = arith.constant dense<0.000000e+00> : vector<8x128xf32>
    %91 = tpu.matmul %89, %90, %cst_68 {dimension_numbers = #tpu.dot_dimension_numbers<[1], [0], [0], [1], [0, 0, 1, 1], [], []>} : vector<8x128xbf16>, vector<128x128xbf16>, vector<8x128xf32> -> vector<8x128xf32>
    %c0_69 = arith.constant 0 : index
    %c0_70 = arith.constant 0 : index
    %92 = vector.load %arg7[%c0_69, %c0_70] : memref<1x128xf32, #tpu.memory_space<vmem>>, vector<1x128xf32>
    %93 = vector.broadcast %92 : vector<1x128xf32> to vector<8x128xf32>
    %94 = arith.addf %91, %93 : vector<8x128xf32>
    %95 = tpu.iota {dimensions = array<i32: 1>} : vector<8x128xi32>
    %c32_i32 = arith.constant 32 : i32
    %96 = vector.broadcast %c32_i32 : i32 to vector<8x128xi32>
    %97 = arith.cmpi slt, %95, %96 : vector<8x128xi32>
    %cst_71 = arith.constant -1.000000e+30 : f32
    %98 = vector.broadcast %cst_71 : f32 to vector<8x128xf32>
    %99 = arith.select %97, %94, %98 : vector<8x128xi1>, vector<8x128xf32>
    %cst_72 = arith.constant dense<0xFF800000> : vector<8xf32>
    %100 = vector.multi_reduction <maximumf>, %99, %cst_72 [1] : vector<8x128xf32> to vector<8xf32>
    %101 = vector.shape_cast %100 : vector<8xf32> to vector<8x1xf32>
    %102 = vector.broadcast %101 : vector<8x1xf32> to vector<8x128xf32>
    %103 = arith.subf %99, %102 : vector<8x128xf32>
    %104 = math.exp %103 : vector<8x128xf32>
    %cst_73 = arith.constant dense<0.000000e+00> : vector<8xf32>
    %105 = vector.multi_reduction <add>, %104, %cst_73 [1] : vector<8x128xf32> to vector<8xf32>
    %106 = vector.shape_cast %105 : vector<8xf32> to vector<8x1xf32>
    %107 = vector.broadcast %106 : vector<8x1xf32> to vector<8x128xf32>
    %108 = arith.divf %104, %107 : vector<8x128xf32>
    %c0_74 = arith.constant 0 : index
    %c0_75 = arith.constant 0 : index
    %109 = vector.load %arg8[%c0_74, %c0_75] : memref<8x128xf32, #tpu.memory_space<vmem>>, vector<8x128xf32>
    tpu.vector_store %arg8[%c0_74, %c0_75], %108 {strides = array<i32>} : memref<8x128xf32, #tpu.memory_space<vmem>>, vector<8x128xf32>,
    return
  }
}

</mosaic_0001>

<bundles_post_ra>
// kernel: tpu_custom_call.1
= control target key start
LH: loop header
LB: loop body
LE: loop exit
PB: predicated region body
PF: predicated region fallthrough
CT: control target
= control target key end

     0   :  { %13 = vsyncpa [#allocation3], 0  ;;  %s4697_s0 = inlined_call_operand.hbm [shape: bf16[128,128], index: 0, kind: input, shape index: {}]   ;;  %s4698_s1 = inlined_call_operand.hbm [shape: bf16[128,128], index: 1, kind: input, shape index: {}]   ;;  %s4699_s2 = inlined_call_operand.hbm [shape: bf16[5,128,128], index: 2, kind: input, shape index: {}]   ;;  %s4700_s3 = inlined_call_operand.hbm [shape: bf16[5,128,128], index: 3, kind: input, shape index: {}]   ;;  %s4701_s4 = inlined_call_operand.vmem [shape: f32[5,1,128], index: 4, kind: input, shape index: {}]   ;;  %s4702_s5 = inlined_call_operand.vmem [shape: f32[8,128], index: 5, kind: input, shape index: {}]   ;;  %s4703_s6 = inlined_call_operand.hbm [shape: bf16[128,128], index: 6, kind: input, shape index: {}]   ;;  %s4704_s7 = inlined_call_operand.vmem [shape: f32[1,128], index: 7, kind: input, shape index: {}]   ;;  %s4705_s8 = inlined_call_operand.hbm [shape: f32[8,128], index: 8, kind: output, shape index: {}]  }
   0x1   :  { %14 = vsyncpa [#allocation6], 0 }
   0x2   :  { %15 = vsyncpa [#allocation9], 0 }
   0x3   :  { %16 = vsyncpa [#allocation4], 0  ;;  %s4189_s27 = smov [#allocation5]   ;;  %s4190_s29 = smov [#allocation8]  }
   0x4   :  { %s34_s28 = sshll.u32 %s4189_s27, 4  ;;  %s58_s30 = sshll.u32 %s4190_s29, 4  ;;  %s35_s28 = int_to_ptr.vmem [resolvable:$true] %s34_s28  ;;  %s4245_s30 = int_to_ptr.vmem [resolvable:$true] %s58_s30 }
   0x5   :  { %s4049_s11 = scalar_lea.hbm %s4698_s1, 1024 }
   0x6   :  { %p4050_p0 = scmp.ne.s32.totalorder %s4698_s1, %s4049_s11  ;;  %p4053_p1 = scmp.lt.u32.totalorder %s4049_s11, %s4698_s1 }
   0x8   :  { %p4055_p2 = pnand %p4053_p1, %p4050_p0 }
   0xa   :  { %4058 = shalt.err (!%p4055_p2)
}
   0xb   :  { %s4059_s16 = scalar_lea.vmem %s35_s28, 1024  ;;  %p4064_p4 = scmp.lt.s32.totalorder %s35_s28, %s35_s28 }
   0xc   :  { %p4060_p3 = scmp.ne.s32.totalorder %s35_s28, %s4059_s16  ;;  %p4065_p5 = scmp.lt.s32.totalorder %s4059_s16, %s4059_s16 }
   0xe   :  { %p4066_p6 = por %p4065_p5, %p4064_p4 }
  0x10   :  { %p4067_p7 = pnand %p4066_p6, %p4060_p3 }
  0x12   :  { %4070 = shalt.err (!%p4067_p7)
}
  0x13   :  { %s4191_s17 = smov 64   ;;  %s4192_s18 = smov 4  }
  0x14   :  { %40 = dma.hbm_to_vmem [thread:$0]  %s4698_s1, 1024, %s35_s28, [#allocation6], %s4191_s17, %s4191_s17, %s4192_s18  }
  0x15   :  { %s4071_s23 = scalar_lea.hbm %s4700_s3, 5120 }
  0x16   :  { %p4072_p8 = scmp.ne.s32.totalorder %s4700_s3, %s4071_s23  ;;  %p4075_p9 = scmp.lt.u32.totalorder %s4071_s23, %s4700_s3 }
  0x18   :  { %p4077_p10 = pnand %p4075_p9, %p4072_p8 }
  0x1a   :  { %4080 = shalt.err (!%p4077_p10)
}
  0x1b   :  { %s4081_s29 = scalar_lea.vmem %s4245_s30, 5120  ;;  %p4086_p12 = scmp.lt.s32.totalorder %s4245_s30, %s4245_s30 }
  0x1c   :  { %p4082_p11 = scmp.ne.s32.totalorder %s4245_s30, %s4081_s29  ;;  %p4087_p13 = scmp.lt.s32.totalorder %s4081_s29, %s4081_s29 }
  0x1e   :  { %p4088_p0 = por %p4087_p13, %p4086_p12 }
  0x20   :  { %p4089_p1 = pnand %p4088_p0, %p4082_p11 }
  0x22   :  { %4092 = shalt.err (!%p4089_p1)
}
  0x23   :  { %64 = dma.hbm_to_vmem [thread:$0]  %s4700_s3, 5120, %s4245_s30, [#allocation9], %s4191_s17, %s4191_s17, %s4192_s18  }
  0x24   :  { %s4193_s9 = smov [#allocation2]   ;;  %s4194_s11 = smov [#allocation7]  }
  0x25   :  { %s22_s10 = sshll.u32 %s4193_s9, 4  ;;  %s46_s12 = sshll.u32 %s4194_s11, 4  ;;  %s23_s10 = int_to_ptr.vmem [resolvable:$true] %s22_s10  ;;  %s4282_s12 = int_to_ptr.vmem [resolvable:$true] %s46_s12 }
  0x26   :  { %s4093_s15 = scalar_lea.hbm %s4697_s0, 1024 }
  0x27   :  { %p4094_p2 = scmp.ne.s32.totalorder %s4697_s0, %s4093_s15  ;;  %p4097_p3 = scmp.lt.u32.totalorder %s4093_s15, %s4697_s0 }
  0x29   :  { %p4099_p4 = pnand %p4097_p3, %p4094_p2 }
  0x2b   :  { %4102 = shalt.err (!%p4099_p4)
}
  0x2c   :  { %s4103_s3 = scalar_lea.vmem %s23_s10, 1024  ;;  %p4108_p6 = scmp.lt.s32.totalorder %s23_s10, %s23_s10 }
  0x2d   :  { %p4104_p5 = scmp.ne.s32.totalorder %s23_s10, %s4103_s3  ;;  %p4109_p7 = scmp.lt.s32.totalorder %s4103_s3, %s4103_s3 }
  0x2f   :  { %p4110_p8 = por %p4109_p7, %p4108_p6 }
  0x31   :  { %p4111_p9 = pnand %p4110_p8, %p4104_p5 }
  0x33   :  { %4114 = shalt.err (!%p4111_p9)
}
  0x34   :  { %28 = dma.hbm_to_vmem [thread:$0]  %s4697_s0, 1024, %s23_s10, [#allocation3], %s4191_s17, %s4191_s17, %s4192_s18  }
  0x35   :  { %s4115_s25 = scalar_lea.hbm %s4699_s2, 5120 }
  0x36   :  { %p4116_p10 = scmp.ne.s32.totalorder %s4699_s2, %s4115_s25  ;;  %p4119_p11 = scmp.lt.u32.totalorder %s4115_s25, %s4699_s2 }
  0x38   :  { %p4121_p12 = pnand %p4119_p11, %p4116_p10 }
  0x3a   :  { %4124 = shalt.err (!%p4121_p12)
}
  0x3b   :  { %s4125_s28 = scalar_lea.vmem %s4282_s12, 5120  ;;  %p4130_p0 = scmp.lt.s32.totalorder %s4282_s12, %s4282_s12 }
  0x3c   :  { %p4126_p13 = scmp.ne.s32.totalorder %s4282_s12, %s4125_s28  ;;  %p4131_p1 = scmp.lt.s32.totalorder %s4125_s28, %s4125_s28 }
  0x3e   :  { %p4132_p2 = por %p4131_p1, %p4130_p0 }
  0x40   :  { %p4133_p3 = pnand %p4132_p2, %p4126_p13 }
  0x42   :  { %4136 = shalt.err (!%p4133_p3)
}
  0x43   :  { %52 = dma.hbm_to_vmem [thread:$0]  %s4699_s2, 5120, %s4282_s12, [#allocation6], %s4191_s17, %s4191_s17, %s4192_s18  }
  0x44   :  { %s4195_s10 = smov [#allocation10]   ;;  %s4137_s15 = scalar_lea.hbm %s4703_s6, 1024 }
  0x45   :  { %s74_s11 = sshll.u32 %s4195_s10, 4  ;;  %p4138_p4 = scmp.ne.s32.totalorder %s4703_s6, %s4137_s15  ;;  %s75_s11 = int_to_ptr.vmem [resolvable:$true] %s74_s11 }
  0x46   :  { %p4141_p5 = scmp.lt.u32.totalorder %s4137_s15, %s4703_s6 }
  0x48   :  { %p4143_p6 = pnand %p4141_p5, %p4138_p4 }
  0x4a   :  { %4146 = shalt.err (!%p4143_p6)
}
  0x4b   :  { %s4147_s3 = scalar_lea.vmem %s75_s11, 1024  ;;  %p4152_p8 = scmp.lt.s32.totalorder %s75_s11, %s75_s11 }
  0x4c   :  { %p4148_p7 = scmp.ne.s32.totalorder %s75_s11, %s4147_s3  ;;  %p4153_p9 = scmp.lt.s32.totalorder %s4147_s3, %s4147_s3 }
  0x4e   :  { %p4154_p10 = por %p4153_p9, %p4152_p8 }
  0x50   :  { %p4155_p11 = pnand %p4154_p10, %p4148_p7 }
  0x52   :  { %4158 = shalt.err (!%p4155_p11)
}
  0x53   :  { %80 = dma.hbm_to_vmem [thread:$0]  %s4703_s6, 1024, %s75_s11, [#allocation9], %s4191_s17, %s4191_s17, %s4192_s18  }
  0x54   :  { %4181 = dma.done.wait [#allocation3], 1024  }
  0x55   :  { %4182 = vsyncadd [#allocation3], 4294966272 }
  0x56   :  { %4183 = dma.done.wait [#allocation6], 6144  }
  0x57   :  { %4184 = vsyncadd [#allocation6], 4294961152 }
  0x58   :  { %4185 = dma.done.wait [#allocation9], 6144  }
  0x59   :  { %4186 = vsyncadd [#allocation9], 4294961152  ;;  %v3933_v0 = vld [vmem:[#allocation5] sm:$0xff]   ;;  %v4334_v1 = vld [vmem:[#allocation5 + $0x8] sm:$0xff]   ;;  %vm4197_vm0 = vmmov 0  }
  0x5a   :  { %3283 = vmatprep.subr.bf16.mxu0 %v3933_v0  ;;  %3331 = vmatprep.mubr.bf16.mxu1 %v3933_v0  ;;  %v4337_v2 = vld [vmem:[#allocation5 + $0x10] sm:$0xff]   ;;  %v4340_v3 = vld [vmem:[#allocation5 + $0x18] sm:$0xff]   ;;  %v4343_v4 = vld [vmem:[#allocation2] sm:$0xff]  }
  0x5b   :  { %3284 = vmatpush3.bf16.msra.mxu0 %v3933_v0  ;;  %3299 = vmatprep.mubr.bf16.mxu0 %v4343_v4  ;;  %v4348_v5 = vld [vmem:[#allocation5 + $0x20] sm:$0xff]   ;;  %v4351_v6 = vld [vmem:[#allocation5 + $0x28] sm:$0xff]   ;;  %v4355_v9 = vld [vmem:[#allocation5 + $0x30] sm:$0xff]  }
  0x5c   :  { %3285 = vmatprep.subr.bf16.mxu0 %v4334_v1  ;;  %v3949_v7 = vld [vmem:[#allocation8] sm:$0xff]   ;;  %v3950_v8 = vld [vmem:[#allocation8 + $0x8] sm:$0xff]   ;;  %v3951_v10 = vld [vmem:[#allocation8 + $0x10] sm:$0xff]  }
  0x5d   :  { %3315 = vmatprep.subr.bf16.mxu1 %v3949_v7  ;;  %v4359_v11 = vld [vmem:[#allocation5 + $0x38] sm:$0xff]   ;;  %v4364_v13 = vld [vmem:[#allocation2 + $0x8] sm:$0xff]   ;;  %v3953_v14 = vld [vmem:[#allocation8 + $0x20] sm:$0xff]  }
  0x5e   :  { %3316 = vmatpush3.bf16.msra.mxu1 %v3949_v7  ;;  %v3952_v12 = vld [vmem:[#allocation8 + $0x18] sm:$0xff]   ;;  %v4366_v15 = vld [vmem:[#allocation2 + $0x10] sm:$0xff]   ;;  %v3954_v16 = vld [vmem:[#allocation8 + $0x28] sm:$0xff]  }
  0x5f   :  { %3286 = vmatpush3.bf16.msra.mxu0 %v4334_v1  ;;  %3317 = vmatprep.subr.bf16.mxu1 %v3950_v8  ;;  %v3955_v17 = vld [vmem:[#allocation8 + $0x30] sm:$0xff]   ;;  %v4371_v18 = vld [vmem:[#allocation2 + $0x18] sm:$0xff]   ;;  %v4373_v19 = vld [vmem:[#allocation2 + $0x20] sm:$0xff]  }
  0x60   :  { %3287 = vmatprep.subr.bf16.mxu0 %v4337_v2  ;;  %v3956_v20 = vld [vmem:[#allocation8 + $0x38] sm:$0xff]   ;;  %v3957_v21 = vld [vmem:[#allocation7] sm:$0xff]   ;;  %v4377_v22 = vld [vmem:[#allocation2 + $0x28] sm:$0xff]  }
  0x61   :  { %v4379_v23 = vld [vmem:[#allocation2 + $0x30] sm:$0xff]   ;;  %v3958_v24 = vld [vmem:[#allocation7 + $0x8] sm:$0xff]   ;;  %v4384_v26 = vld [vmem:[#allocation2 + $0x38] sm:$0xff]  }
  0x62   :  { %3318 = vmatpush3.bf16.msra.mxu1 %v3950_v8  ;;  %v3959_v25 = vld [vmem:[#allocation7 + $0x10] sm:$0xff]   ;;  %v3960_v27 = vld [vmem:[#allocation7 + $0x18] sm:$0xff]   ;;  %v3961_v28 = vld [vmem:[#allocation7 + $0x20] sm:$0xff]  }
  0x63   :  { %3288 = vmatpush3.bf16.msra.mxu0 %v4337_v2  ;;  %3319 = vmatprep.subr.bf16.mxu1 %v3951_v10  ;;  %v3962_v29 = vld [vmem:[#allocation7 + $0x28] sm:$0xff]   ;;  %v3963_v30 = vld [vmem:[#allocation7 + $0x30] sm:$0xff]   ;;  %v3964_v31 = vld [vmem:[#allocation7 + $0x38] sm:$0xff]  }
  0x64   :  { %3289 = vmatprep.subr.bf16.mxu0 %v4340_v3  ;;  %v2935_v56 = vld [vmem:[%s4701_s4] ss:$0 sm:$0xff] }
  0x66   :  { %3320 = vmatpush3.bf16.msra.mxu1 %v3951_v10 }
  0x67   :  { %3290 = vmatpush3.bf16.msra.mxu0 %v4340_v3  ;;  %3321 = vmatprep.subr.bf16.mxu1 %v3952_v12 }
  0x68   :  { %3291 = vmatprep.subr.bf16.mxu0 %v4348_v5 }
  0x6a   :  { %3322 = vmatpush3.bf16.msra.mxu1 %v3952_v12 }
  0x6b   :  { %3292 = vmatpush3.bf16.msra.mxu0 %v4348_v5  ;;  %3323 = vmatprep.subr.bf16.mxu1 %v3953_v14 }
  0x6c   :  { %3293 = vmatprep.subr.bf16.mxu0 %v4351_v6 }
  0x6e   :  { %3324 = vmatpush3.bf16.msra.mxu1 %v3953_v14 }
  0x6f   :  { %3294 = vmatpush3.bf16.msra.mxu0 %v4351_v6  ;;  %3325 = vmatprep.subr.bf16.mxu1 %v3954_v16 }
  0x70   :  { %3295 = vmatprep.subr.bf16.mxu0 %v4355_v9 }
  0x72   :  { %3326 = vmatpush3.bf16.msra.mxu1 %v3954_v16 }
  0x73   :  { %3296 = vmatpush3.bf16.msra.mxu0 %v4355_v9  ;;  %3327 = vmatprep.subr.bf16.mxu1 %v3955_v17 }
  0x74   :  { %3297 = vmatprep.subr.bf16.mxu0 %v4359_v11 }
  0x76   :  { %3328 = vmatpush3.bf16.msra.mxu1 %v3955_v17 }
  0x77   :  { %3298 = vmatpush3.bf16.msra.mxu0 %v4359_v11  ;;  %3329 = vmatprep.subr.bf16.mxu1 %v3956_v20 }
  0x7a   :  { %3300 = vmatmul.mubr.bf16.vlgmr.msra.gmra.mrb[0].mxu0 %v4364_v13  ;;  %3330 = vmatpush3.bf16.msra.mxu1 %v3956_v20 }
  0x7b   :  { %3303 = vmatprep.mubr.bf16.mxu0 %v4366_v15  ;;  %3347 = vmatprep.subr.bf16.mxu1 %v3957_v21 }
  0x7d   :  { %3332 = vmatmul.mubr.bf16.vlgmr.msra.gmra.mrb[0].mxu1 %v4334_v1 }
  0x7e   :  { %3348 = vmatpush3.bf16.msra.mxu1 %v3957_v21  ;;  %3335 = vmatprep.mubr.bf16.mxu1 %v4337_v2 }
  0x7f   :  { %3349 = vmatprep.subr.bf16.mxu1 %v3958_v24 }
  0x82   :  { %3304 = vmatmul.mubr.bf16.gmra.mrb[4].mxu0 %v4371_v18  ;;  %3350 = vmatpush3.bf16.msra.mxu1 %v3958_v24 }
  0x83   :  { %3307 = vmatprep.mubr.bf16.mxu0 %v4373_v19  ;;  %3351 = vmatprep.subr.bf16.mxu1 %v3959_v25 }
  0x85   :  { %3336 = vmatmul.mubr.bf16.gmra.mrb[4].mxu1 %v4340_v3 }
  0x86   :  { %3352 = vmatpush3.bf16.msra.mxu1 %v3959_v25  ;;  %3339 = vmatprep.mubr.bf16.mxu1 %v4348_v5 }
  0x87   :  { %3353 = vmatprep.subr.bf16.mxu1 %v3960_v27 }
  0x8a   :  { %3308 = vmatmul.mubr.bf16.gmra.mrb[8].mxu0 %v4377_v22  ;;  %3354 = vmatpush3.bf16.msra.mxu1 %v3960_v27 }
  0x8b   :  { %3311 = vmatprep.mubr.bf16.mxu0 %v4379_v23  ;;  %3355 = vmatprep.subr.bf16.mxu1 %v3961_v28 }
  0x8d   :  { %3340 = vmatmul.mubr.bf16.gmra.mrb[8].mxu1 %v4351_v6 }
  0x8e   :  { %3356 = vmatpush3.bf16.msra.mxu1 %v3961_v28  ;;  %3343 = vmatprep.mubr.bf16.mxu1 %v4355_v9 }
  0x8f   :  { %3357 = vmatprep.subr.bf16.mxu1 %v3962_v29 }
  0x92   :  { %3312 = vmatmul.mubr.bf16.gmra.mrb[12].mxu0 %v4384_v26  ;;  %3358 = vmatpush3.bf16.msra.mxu1 %v3962_v29 }
  0x93   :  { %3395 = vmatprep.mubr.bf16.mxu0 %v4343_v4  ;;  %3359 = vmatprep.subr.bf16.mxu1 %v3963_v30 }
  0x95   :  { %3344 = vmatmul.mubr.bf16.gmra.mrb[12].mxu1 %v4359_v11 }
  0x96   :  { %3360 = vmatpush3.bf16.msra.mxu1 %v3963_v30 }
  0x97   :  { %3361 = vmatprep.subr.bf16.mxu1 %v3964_v31 }
  0x9a   :  { %3362 = vmatpush3.bf16.msra.mxu1 %v3964_v31 }
 0x14d   :  { %v3301_v32 = vpop.f32.mrb[0].mxu0 }
 0x14e   :  { %v261_v33 = vpop.f32.mrb[1].mxu0 }
 0x14f   :  { %v3302_v34 = vpop.f32.mrb[2].mxu0 }
 0x150   :  { %v325_v35 = vpack.c.bf16 %v3302_v34, %v3301_v32  ;;  %v264_v36 = vpop.f32.mrb[3].mxu0 }
 0x151   :  { %v324_v37 = vpack.c.bf16 %v264_v36, %v261_v33 }
 0x153   :  { %3363 = vmatprep.mubr.bf16.mxu1 %v324_v37 }
 0x154   :  { %3364 = vmatmul.mubr.bf16.vlgmr.msra.gmra.mrb[0].mxu1 %v325_v35 }
 0x155   :  { %v3305_v38 = vpop.f32.mrb[4].mxu0 }
 0x156   :  { %v277_v39 = vpop.f32.mrb[5].mxu0 }
 0x157   :  { %v3306_v40 = vpop.f32.mrb[6].mxu0 }
 0x158   :  { %v327_v41 = vpack.c.bf16 %v3306_v40, %v3305_v38  ;;  %v280_v42 = vpop.f32.mrb[7].mxu0 }
 0x159   :  { %v326_v43 = vpack.c.bf16 %v280_v42, %v277_v39 }
 0x15b   :  { %3367 = vmatprep.mubr.bf16.mxu1 %v326_v43 }
 0x15c   :  { %3368 = vmatmul.mubr.bf16.gmra.mrb[4].mxu1 %v327_v41 }
 0x15d   :  { %v3309_v44 = vpop.f32.mrb[8].mxu0 }
 0x15e   :  { %v293_v45 = vpop.f32.mrb[9].mxu0 }
 0x15f   :  { %v3310_v46 = vpop.f32.mrb[10].mxu0 }
 0x160   :  { %v329_v47 = vpack.c.bf16 %v3310_v46, %v3309_v44  ;;  %v296_v48 = vpop.f32.mrb[11].mxu0 }
 0x161   :  { %v328_v49 = vpack.c.bf16 %v296_v48, %v293_v45 }
 0x163   :  { %3371 = vmatprep.mubr.bf16.mxu1 %v328_v49 }
 0x164   :  { %3372 = vmatmul.mubr.bf16.gmra.mrb[8].mxu1 %v329_v47 }
 0x165   :  { %v3313_v50 = vpop.f32.mrb[12].mxu0 }
 0x166   :  { %v309_v51 = vpop.f32.mrb[13].mxu0 }
 0x167   :  { %v3314_v52 = vpop.f32.mrb[14].mxu0 }
 0x168   :  { %v331_v53 = vpack.c.bf16 %v3314_v52, %v3313_v50  ;;  %v312_v54 = vpop.f32.mrb[15].mxu0 }
 0x169   :  { %v330_v55 = vpack.c.bf16 %v312_v54, %v309_v51 }
 0x16b   :  { %3375 = vmatprep.mubr.bf16.mxu1 %v330_v55 }
 0x16c   :  { %3376 = vmatmul.mubr.bf16.gmra.mrb[12].mxu1 %v331_v53 }
 0x16d   :  { %3491 = vmatprep.mubr.bf16.mxu1 %v4343_v4 }
 0x227   :  { %v3365_v57 = vpop.f32.mrb[0].mxu1 }
 0x228   :  { %v663_v58 = vadd.f32 %v3365_v57, %v2935_v56  ;;  %v591_v59 = vpop.f32.mrb[1].mxu1 }
 0x229   :  { %v661_v60 = vadd.f32 %v2935_v56, %v591_v59  ;;  %v3366_v61 = vpop.f32.mrb[2].mxu1  ;;  %v3967_v59 = vld [vmem:[#allocation8 + $0x50] sm:$0xff]  }
 0x22a   :  { %v664_v62 = vadd.f32 %v3366_v61, %v2935_v56  ;;  %v594_v63 = vpop.f32.mrb[3].mxu1  ;;  %v679_v1 = vmax.f32 %v663_v58, 0.0  ;;  %v3965_v58 = vld [vmem:[#allocation8 + $0x40] sm:$0xff]  }
 0x22b   :  { %v662_v0 = vadd.f32 %v2935_v56, %v594_v63  ;;  %v677_v3 = vmax.f32 %v661_v60, 0.0  ;;  %v3968_v60 = vld [vmem:[#allocation8 + $0x58] sm:$0xff]   ;;  %v3969_v61 = vld [vmem:[#allocation8 + $0x60] sm:$0xff]   ;;  %v3971_v63 = vld [vmem:[#allocation8 + $0x70] sm:$0xff]  }
 0x22c   :  { %v680_v2 = vmax.f32 %v664_v62, 0.0  ;;  %v3970_v62 = vld [vmem:[#allocation8 + $0x68] sm:$0xff]  }
 0x22d   :  { %v678_v5 = vmax.f32 %v662_v0, 0.0  ;;  %v3972_v0 = vld [vmem:[#allocation8 + $0x78] sm:$0xff]  }
 0x22e   :  { %v4398_v6 = vpack.c.bf16 %v680_v2, %v679_v1  ;;  %v3973_v1 = vld [vmem:[#allocation7 + $0x40] sm:$0xff]   ;;  %v3974_v2 = vld [vmem:[#allocation7 + $0x48] sm:$0xff]  }
 0x22f   :  { %v4400_v7 = vpack.c.bf16 %v678_v5, %v677_v3  ;;  %v3369_v8 = vpop.f32.mrb[4].mxu1  ;;  %v3975_v3 = vld [vmem:[#allocation7 + $0x50] sm:$0xff]   ;;  %v3976_v5 = vld [vmem:[#allocation7 + $0x58] sm:$0xff]  }
 0x230   :  { %v667_v9 = vadd.f32 %v3369_v8, %v2935_v56  ;;  %v607_v10 = vpop.f32.mrb[5].mxu1  ;;  %v3978_v8 = vld [vmem:[#allocation7 + $0x68] sm:$0xff]  }
 0x231   :  { %v665_v11 = vadd.f32 %v2935_v56, %v607_v10  ;;  %v3370_v12 = vpop.f32.mrb[6].mxu1  ;;  %3379 = vmatprep.subr.bf16.mxu0 %v4400_v7 }
 0x232   :  { %v668_v14 = vadd.f32 %v3370_v12, %v2935_v56  ;;  %v610_v16 = vpop.f32.mrb[7].mxu1  ;;  %3380 = vmatpush3.bf16.msra.mxu0 %v4400_v7  ;;  %v683_v20 = vmax.f32 %v667_v9, 0.0  ;;  %v3980_v9 = vld [vmem:[#allocation7 + $0x78] sm:$0xff]  }
 0x233   :  { %v666_v17 = vadd.f32 %v2935_v56, %v610_v16  ;;  %3381 = vmatprep.subr.bf16.mxu0 %v4398_v6  ;;  %v681_v24 = vmax.f32 %v665_v11, 0.0 }
 0x234   :  { %v684_v21 = vmax.f32 %v668_v14, 0.0 }
 0x235   :  { %v682_v25 = vmax.f32 %v666_v17, 0.0 }
 0x236   :  { %v4405_v27 = vpack.c.bf16 %v684_v21, %v683_v20  ;;  %3382 = vmatpush3.bf16.msra.mxu0 %v4398_v6 }
 0x237   :  { %v4408_v28 = vpack.c.bf16 %v682_v25, %v681_v24  ;;  %v3373_v29 = vpop.f32.mrb[8].mxu1 }
 0x238   :  { %v671_v30 = vadd.f32 %v3373_v29, %v2935_v56  ;;  %v623_v31 = vpop.f32.mrb[9].mxu1 }
 0x239   :  { %v669_v32 = vadd.f32 %v2935_v56, %v623_v31  ;;  %v3374_v33 = vpop.f32.mrb[10].mxu1  ;;  %3383 = vmatprep.subr.bf16.mxu0 %v4408_v28 }
 0x23a   :  { %v672_v34 = vadd.f32 %v3374_v33, %v2935_v56  ;;  %v626_v35 = vpop.f32.mrb[11].mxu1  ;;  %3384 = vmatpush3.bf16.msra.mxu0 %v4408_v28  ;;  %v687_v37 = vmax.f32 %v671_v30, 0.0 }
 0x23b   :  { %v670_v36 = vadd.f32 %v2935_v56, %v626_v35  ;;  %3385 = vmatprep.subr.bf16.mxu0 %v4405_v27  ;;  %v685_v39 = vmax.f32 %v669_v32, 0.0 }
 0x23c   :  { %v688_v38 = vmax.f32 %v672_v34, 0.0 }
 0x23d   :  { %v686_v40 = vmax.f32 %v670_v36, 0.0 }
 0x23e   :  { %v4413_v41 = vpack.c.bf16 %v688_v38, %v687_v37  ;;  %3386 = vmatpush3.bf16.msra.mxu0 %v4405_v27 }
 0x23f   :  { %v4416_v42 = vpack.c.bf16 %v686_v40, %v685_v39  ;;  %v3377_v43 = vpop.f32.mrb[12].mxu1 }
 0x240   :  { %v675_v44 = vadd.f32 %v3377_v43, %v2935_v56  ;;  %v639_v45 = vpop.f32.mrb[13].mxu1 }
 0x241   :  { %v673_v46 = vadd.f32 %v2935_v56, %v639_v45  ;;  %v3378_v47 = vpop.f32.mrb[14].mxu1  ;;  %3387 = vmatprep.subr.bf16.mxu0 %v4416_v42 }
 0x242   :  { %v676_v48 = vadd.f32 %v3378_v47, %v2935_v56  ;;  %v642_v49 = vpop.f32.mrb[15].mxu1  ;;  %3388 = vmatpush3.bf16.msra.mxu0 %v4416_v42  ;;  %v691_v51 = vmax.f32 %v675_v44, 0.0 }
 0x243   :  { %v674_v50 = vadd.f32 %v2935_v56, %v642_v49  ;;  %3389 = vmatprep.subr.bf16.mxu0 %v4413_v41  ;;  %v689_v53 = vmax.f32 %v673_v46, 0.0  ;;  %v3966_v56 = vld [vmem:[#allocation8 + $0x48] sm:$0xff]  }
 0x244   :  { %v692_v52 = vmax.f32 %v676_v48, 0.0 }
 0x245   :  { %v690_v54 = vmax.f32 %v674_v50, 0.0 }
 0x246   :  { %v4421_v55 = vpack.c.bf16 %v692_v52, %v691_v51  ;;  %3390 = vmatpush3.bf16.msra.mxu0 %v4413_v41 }
 0x247   :  { %v699_v57 = vpack.c.bf16 %v690_v54, %v689_v53 }
 0x249   :  { %3391 = vmatprep.subr.bf16.mxu0 %v699_v57 }
 0x24a   :  { %3392 = vmatpush3.bf16.msra.mxu0 %v699_v57 }
 0x24b   :  { %3393 = vmatprep.subr.bf16.mxu0 %v4421_v55 }
 0x24e   :  { %3394 = vmatpush3.bf16.msra.mxu0 %v4421_v55 }
 0x24f   :  { %3411 = vmatprep.subr.bf16.mxu0 %v3965_v58 }
 0x251   :  { %3396 = vmatmul.mubr.bf16.vlgmr.msra.gmra.mrb[16].mxu0 %v4364_v13 }
 0x252   :  { %3412 = vmatpush3.bf16.msra.mxu0 %v3965_v58  ;;  %3399 = vmatprep.mubr.bf16.mxu0 %v4366_v15 }
 0x253   :  { %3413 = vmatprep.subr.bf16.mxu0 %v3966_v56 }
 0x256   :  { %3414 = vmatpush3.bf16.msra.mxu0 %v3966_v56 }
 0x257   :  { %3415 = vmatprep.subr.bf16.mxu0 %v3967_v59 }
 0x259   :  { %3400 = vmatmul.mubr.bf16.gmra.mrb[20].mxu0 %v4371_v18 }
 0x25a   :  { %3416 = vmatpush3.bf16.msra.mxu0 %v3967_v59  ;;  %3403 = vmatprep.mubr.bf16.mxu0 %v4373_v19 }
 0x25b   :  { %3417 = vmatprep.subr.bf16.mxu0 %v3968_v60 }
 0x25e   :  { %3418 = vmatpush3.bf16.msra.mxu0 %v3968_v60 }
 0x25f   :  { %3419 = vmatprep.subr.bf16.mxu0 %v3969_v61 }
 0x261   :  { %3404 = vmatmul.mubr.bf16.gmra.mrb[24].mxu0 %v4377_v22 }
 0x262   :  { %3420 = vmatpush3.bf16.msra.mxu0 %v3969_v61  ;;  %3407 = vmatprep.mubr.bf16.mxu0 %v4379_v23 }
 0x263   :  { %3421 = vmatprep.subr.bf16.mxu0 %v3970_v62 }
 0x266   :  { %3422 = vmatpush3.bf16.msra.mxu0 %v3970_v62 }
 0x267   :  { %3423 = vmatprep.subr.bf16.mxu0 %v3971_v63 }
 0x269   :  { %3408 = vmatmul.mubr.bf16.gmra.mrb[28].mxu0 %v4384_v26 }
 0x26a   :  { %3424 = vmatpush3.bf16.msra.mxu0 %v3971_v63  ;;  %3427 = vmatprep.mubr.bf16.mxu0 %v4400_v7  ;;  %v3977_v7 = vld [vmem:[#allocation7 + $0x60] sm:$0xff]  }
 0x26b   :  { %3425 = vmatprep.subr.bf16.mxu0 %v3972_v0 }
 0x26e   :  { %3426 = vmatpush3.bf16.msra.mxu0 %v3972_v0 }
 0x26f   :  { %3443 = vmatprep.subr.bf16.mxu0 %v3973_v1 }
 0x271   :  { %3428 = vmatmul.mubr.bf16.vlgmr.msra.gmra.mrb[32].mxu0 %v4398_v6  ;;  %v3979_v6 = vld [vmem:[#allocation7 + $0x70] sm:$0xff]  }
 0x272   :  { %3431 = vmatprep.mubr.bf16.mxu0 %v4408_v28  ;;  %3444 = vmatpush3.bf16.msra.mxu0 %v3973_v1 }
 0x273   :  { %3445 = vmatprep.subr.bf16.mxu0 %v3974_v2 }
 0x276   :  { %3446 = vmatpush3.bf16.msra.mxu0 %v3974_v2 }
 0x277   :  { %3447 = vmatprep.subr.bf16.mxu0 %v3975_v3 }
 0x279   :  { %3432 = vmatmul.mubr.bf16.gmra.mrb[36].mxu0 %v4405_v27 }
 0x27a   :  { %3435 = vmatprep.mubr.bf16.mxu0 %v4416_v42  ;;  %3448 = vmatpush3.bf16.msra.mxu0 %v3975_v3 }
 0x27b   :  { %3449 = vmatprep.subr.bf16.mxu0 %v3976_v5 }
 0x27e   :  { %3450 = vmatpush3.bf16.msra.mxu0 %v3976_v5 }
 0x27f   :  { %3451 = vmatprep.subr.bf16.mxu0 %v3977_v7 }
 0x281   :  { %3436 = vmatmul.mubr.bf16.gmra.mrb[40].mxu0 %v4413_v41  ;;  %v2953_v41 = vld [vmem:[%s4701_s4 + $0x1] ss:$0 sm:$0xff] }
 0x282   :  { %3439 = vmatprep.mubr.bf16.mxu0 %v699_v57  ;;  %3452 = vmatpush3.bf16.msra.mxu0 %v3977_v7 }
 0x283   :  { %3453 = vmatprep.subr.bf16.mxu0 %v3978_v8 }
 0x286   :  { %3454 = vmatpush3.bf16.msra.mxu0 %v3978_v8 }
 0x287   :  { %3455 = vmatprep.subr.bf16.mxu0 %v3979_v6 }
 0x289   :  { %3440 = vmatmul.mubr.bf16.gmra.mrb[44].mxu0 %v4421_v55 }
 0x28a   :  { %3456 = vmatpush3.bf16.msra.mxu0 %v3979_v6 }
 0x28b   :  { %3457 = vmatprep.subr.bf16.mxu0 %v3980_v9 }
 0x28e   :  { %3458 = vmatpush3.bf16.msra.mxu0 %v3980_v9 }
 0x324   :  { %v3397_v10 = vpop.f32.mrb[16].mxu0 }
 0x325   :  { %v735_v11 = vpop.f32.mrb[17].mxu0 }
 0x326   :  { %v3398_v12 = vpop.f32.mrb[18].mxu0 }
 0x327   :  { %v799_v14 = vpack.c.bf16 %v3398_v12, %v3397_v10  ;;  %v738_v16 = vpop.f32.mrb[19].mxu0 }
 0x328   :  { %v798_v17 = vpack.c.bf16 %v738_v16, %v735_v11 }
 0x32a   :  { %3459 = vmatprep.mubr.bf16.mxu0 %v798_v17 }
 0x32b   :  { %3460 = vmatmul.mubr.bf16.vlgmr.msra.gmra.mrb[32].mxu0 %v799_v14 }
 0x32c   :  { %v3401_v20 = vpop.f32.mrb[20].mxu0 }
 0x32d   :  { %v751_v21 = vpop.f32.mrb[21].mxu0 }
 0x32e   :  { %v3402_v24 = vpop.f32.mrb[22].mxu0 }
 0x32f   :  { %v801_v25 = vpack.c.bf16 %v3402_v24, %v3401_v20  ;;  %v754_v27 = vpop.f32.mrb[23].mxu0 }
 0x330   :  { %v800_v28 = vpack.c.bf16 %v754_v27, %v751_v21 }
 0x332   :  { %3463 = vmatprep.mubr.bf16.mxu0 %v800_v28 }
 0x333   :  { %3464 = vmatmul.mubr.bf16.gmra.mrb[36].mxu0 %v801_v25 }
 0x334   :  { %v3405_v29 = vpop.f32.mrb[24].mxu0 }
 0x335   :  { %v767_v30 = vpop.f32.mrb[25].mxu0 }
 0x336   :  { %v3406_v31 = vpop.f32.mrb[26].mxu0 }
 0x337   :  { %v803_v32 = vpack.c.bf16 %v3406_v31, %v3405_v29  ;;  %v770_v33 = vpop.f32.mrb[27].mxu0 }
 0x338   :  { %v802_v34 = vpack.c.bf16 %v770_v33, %v767_v30 }
 0x33a   :  { %3467 = vmatprep.mubr.bf16.mxu0 %v802_v34 }
 0x33b   :  { %3468 = vmatmul.mubr.bf16.gmra.mrb[40].mxu0 %v803_v32 }
 0x33c   :  { %v3409_v35 = vpop.f32.mrb[28].mxu0 }
 0x33d   :  { %v783_v36 = vpop.f32.mrb[29].mxu0 }
 0x33e   :  { %v3410_v37 = vpop.f32.mrb[30].mxu0 }
 0x33f   :  { %v805_v38 = vpack.c.bf16 %v3410_v37, %v3409_v35  ;;  %v786_v39 = vpop.f32.mrb[31].mxu0 }
 0x340   :  { %v804_v40 = vpack.c.bf16 %v786_v39, %v783_v36 }
 0x342   :  { %3471 = vmatprep.mubr.bf16.mxu0 %v804_v40 }
 0x343   :  { %3472 = vmatmul.mubr.bf16.gmra.mrb[44].mxu0 %v805_v38 }
 0x344   :  { %3587 = vmatprep.mubr.bf16.mxu0 %v4343_v4 }
 0x3fe   :  { %v3461_v42 = vpop.f32.mrb[32].mxu0 }
 0x3ff   :  { %v1140_v43 = vadd.f32 %v3461_v42, %v2953_v41  ;;  %v1067_v44 = vpop.f32.mrb[33].mxu0  ;;  %v3981_v42 = vld [vmem:[#allocation8 + $0x80] sm:$0xff]  }
 0x400   :  { %v1138_v45 = vadd.f32 %v2953_v41, %v1067_v44  ;;  %v3462_v46 = vpop.f32.mrb[34].mxu0  ;;  %v3984_v44 = vld [vmem:[#allocation8 + $0x98] sm:$0xff]  }
 0x401   :  { %v1141_v47 = vadd.f32 %v3462_v46, %v2953_v41  ;;  %v1070_v48 = vpop.f32.mrb[35].mxu0  ;;  %v1156_v50 = vmax.f32 %v1140_v43, 0.0  ;;  %v3983_v43 = vld [vmem:[#allocation8 + $0x90] sm:$0xff]   ;;  %v3986_v46 = vld [vmem:[#allocation8 + $0xa8] sm:$0xff]  }
 0x402   :  { %v1139_v49 = vadd.f32 %v2953_v41, %v1070_v48  ;;  %v1154_v52 = vmax.f32 %v1138_v45, 0.0  ;;  %v3985_v45 = vld [vmem:[#allocation8 + $0xa0] sm:$0xff]   ;;  %v3995_v48 = vld [vmem:[#allocation7 + $0xb0] sm:$0xff]  }
 0x403   :  { %v1157_v51 = vmax.f32 %v1141_v47, 0.0  ;;  %v3994_v47 = vld [vmem:[#allocation7 + $0xa8] sm:$0xff]  }
 0x404   :  { %v1155_v53 = vmax.f32 %v1139_v49, 0.0  ;;  %v3996_v49 = vld [vmem:[#allocation7 + $0xb8] sm:$0xff]  }
 0x405   :  { %v4444_v54 = vpack.c.bf16 %v1157_v51, %v1156_v50 }
 0x406   :  { %v4446_v55 = vpack.c.bf16 %v1155_v53, %v1154_v52  ;;  %v3465_v4 = vpop.f32.mrb[36].mxu0 }
 0x407   :  { %v1144_v57 = vadd.f32 %v3465_v4, %v2953_v41  ;;  %v1083_v58 = vpop.f32.mrb[37].mxu0 }
 0x408   :  { %v1142_v56 = vadd.f32 %v2953_v41, %v1083_v58  ;;  %v3466_v59 = vpop.f32.mrb[38].mxu0  ;;  %3475 = vmatprep.subr.bf16.mxu1 %v4446_v55 }
 0x409   :  { %v1145_v60 = vadd.f32 %v3466_v59, %v2953_v41  ;;  %v1086_v61 = vpop.f32.mrb[39].mxu0  ;;  %3476 = vmatpush3.bf16.msra.mxu1 %v4446_v55  ;;  %v1160_v63 = vmax.f32 %v1144_v57, 0.0 }
 0x40a   :  { %v1143_v62 = vadd.f32 %v2953_v41, %v1086_v61  ;;  %3477 = vmatprep.subr.bf16.mxu1 %v4444_v54  ;;  %v1158_v1 = vmax.f32 %v1142_v56, 0.0 }
 0x40b   :  { %v1161_v0 = vmax.f32 %v1145_v60, 0.0 }
 0x40c   :  { %v1159_v2 = vmax.f32 %v1143_v62, 0.0 }
 0x40d   :  { %v4451_v3 = vpack.c.bf16 %v1161_v0, %v1160_v63  ;;  %3478 = vmatpush3.bf16.msra.mxu1 %v4444_v54 }
 0x40e   :  { %v4454_v5 = vpack.c.bf16 %v1159_v2, %v1158_v1  ;;  %v3469_v7 = vpop.f32.mrb[40].mxu0 }
 0x40f   :  { %v1148_v8 = vadd.f32 %v3469_v7, %v2953_v41  ;;  %v1099_v6 = vpop.f32.mrb[41].mxu0 }
 0x410   :  { %v1146_v9 = vadd.f32 %v2953_v41, %v1099_v6  ;;  %v3470_v10 = vpop.f32.mrb[42].mxu0  ;;  %3479 = vmatprep.subr.bf16.mxu1 %v4454_v5 }
 0x411   :  { %v1149_v11 = vadd.f32 %v3470_v10, %v2953_v41  ;;  %v1102_v12 = vpop.f32.mrb[43].mxu0  ;;  %3480 = vmatpush3.bf16.msra.mxu1 %v4454_v5  ;;  %v1164_v16 = vmax.f32 %v1148_v8, 0.0  ;;  %v4041_v10 = vld [vmem:[#allocation2] sm:$0xff]  }
 0x412   :  { %v1147_v14 = vadd.f32 %v2953_v41, %v1102_v12  ;;  %3481 = vmatprep.subr.bf16.mxu1 %v4451_v3  ;;  %v1162_v20 = vmax.f32 %v1146_v9, 0.0 }
 0x413   :  { %v1165_v17 = vmax.f32 %v1149_v11, 0.0  ;;  %v2971_v11 = vld [vmem:[%s4701_s4 + $0x2] ss:$0 sm:$0xff] }
 0x414   :  { %v1163_v21 = vmax.f32 %v1147_v14, 0.0 }
 0x415   :  { %v4459_v24 = vpack.c.bf16 %v1165_v17, %v1164_v16  ;;  %3482 = vmatpush3.bf16.msra.mxu1 %v4451_v3 }
 0x416   :  { %v4462_v25 = vpack.c.bf16 %v1163_v21, %v1162_v20  ;;  %v3473_v27 = vpop.f32.mrb[44].mxu0 }
 0x417   :  { %v1152_v28 = vadd.f32 %v3473_v27, %v2953_v41  ;;  %v1115_v29 = vpop.f32.mrb[45].mxu0 }
 0x418   :  { %v1150_v30 = vadd.f32 %v2953_v41, %v1115_v29  ;;  %v3474_v31 = vpop.f32.mrb[46].mxu0  ;;  %3483 = vmatprep.subr.bf16.mxu1 %v4462_v25 }
 0x419   :  { %v1153_v32 = vadd.f32 %v3474_v31, %v2953_v41  ;;  %v1118_v33 = vpop.f32.mrb[47].mxu0  ;;  %3484 = vmatpush3.bf16.msra.mxu1 %v4462_v25  ;;  %v1168_v35 = vmax.f32 %v1152_v28, 0.0 }
 0x41a   :  { %v1151_v34 = vadd.f32 %v2953_v41, %v1118_v33  ;;  %3485 = vmatprep.subr.bf16.mxu1 %v4459_v24  ;;  %v1166_v37 = vmax.f32 %v1150_v30, 0.0  ;;  %v3982_v41 = vld [vmem:[#allocation8 + $0x88] sm:$0xff]  }
 0x41b   :  { %v1169_v36 = vmax.f32 %v1153_v32, 0.0 }
 0x41c   :  { %v1167_v38 = vmax.f32 %v1151_v34, 0.0 }
 0x41d   :  { %v4467_v39 = vpack.c.bf16 %v1169_v36, %v1168_v35  ;;  %3486 = vmatpush3.bf16.msra.mxu1 %v4459_v24 }
 0x41e   :  { %v1176_v40 = vpack.c.bf16 %v1167_v38, %v1166_v37 }
 0x420   :  { %3487 = vmatprep.subr.bf16.mxu1 %v1176_v40 }
 0x421   :  { %3488 = vmatpush3.bf16.msra.mxu1 %v1176_v40 }
 0x422   :  { %3489 = vmatprep.subr.bf16.mxu1 %v4467_v39 }
 0x425   :  { %3490 = vmatpush3.bf16.msra.mxu1 %v4467_v39 }
 0x426   :  { %3507 = vmatprep.subr.bf16.mxu1 %v3981_v42 }
 0x428   :  { %3492 = vmatmul.mubr.bf16.vlgmr.msra.gmra.mrb[16].mxu1 %v4364_v13  ;;  %v3987_v13 = vld [vmem:[#allocation8 + $0xb0] sm:$0xff]  }
 0x429   :  { %3508 = vmatpush3.bf16.msra.mxu1 %v3981_v42  ;;  %3495 = vmatprep.mubr.bf16.mxu1 %v4366_v15  ;;  %v3988_v15 = vld [vmem:[#allocation8 + $0xb8] sm:$0xff]  }
 0x42a   :  { %3509 = vmatprep.subr.bf16.mxu1 %v3982_v41 }
 0x42d   :  { %3510 = vmatpush3.bf16.msra.mxu1 %v3982_v41 }
 0x42e   :  { %3511 = vmatprep.subr.bf16.mxu1 %v3983_v43 }
 0x430   :  { %3496 = vmatmul.mubr.bf16.gmra.mrb[20].mxu1 %v4371_v18  ;;  %v3989_v18 = vld [vmem:[#allocation7 + $0x80] sm:$0xff]  }
 0x431   :  { %3512 = vmatpush3.bf16.msra.mxu1 %v3983_v43  ;;  %3499 = vmatprep.mubr.bf16.mxu1 %v4373_v19  ;;  %v3990_v19 = vld [vmem:[#allocation7 + $0x88] sm:$0xff]  }
 0x432   :  { %3513 = vmatprep.subr.bf16.mxu1 %v3984_v44 }
 0x435   :  { %3514 = vmatpush3.bf16.msra.mxu1 %v3984_v44 }
 0x436   :  { %3515 = vmatprep.subr.bf16.mxu1 %v3985_v45 }
 0x438   :  { %3500 = vmatmul.mubr.bf16.gmra.mrb[24].mxu1 %v4377_v22  ;;  %v3991_v22 = vld [vmem:[#allocation7 + $0x90] sm:$0xff]  }
 0x439   :  { %3516 = vmatpush3.bf16.msra.mxu1 %v3985_v45  ;;  %3503 = vmatprep.mubr.bf16.mxu1 %v4379_v23  ;;  %v3992_v23 = vld [vmem:[#allocation7 + $0x98] sm:$0xff]  }
 0x43a   :  { %3517 = vmatprep.subr.bf16.mxu1 %v3986_v46 }
 0x43d   :  { %3518 = vmatpush3.bf16.msra.mxu1 %v3986_v46 }
 0x43e   :  { %3519 = vmatprep.subr.bf16.mxu1 %v3987_v13 }
 0x440   :  { %3504 = vmatmul.mubr.bf16.gmra.mrb[28].mxu1 %v4384_v26  ;;  %v3993_v26 = vld [vmem:[#allocation7 + $0xa0] sm:$0xff]  }
 0x441   :  { %3520 = vmatpush3.bf16.msra.mxu1 %v3987_v13  ;;  %3523 = vmatprep.mubr.bf16.mxu1 %v4446_v55 }
 0x442   :  { %3521 = vmatprep.subr.bf16.mxu1 %v3988_v15 }
 0x445   :  { %3522 = vmatpush3.bf16.msra.mxu1 %v3988_v15 }
 0x446   :  { %3539 = vmatprep.subr.bf16.mxu1 %v3989_v18 }
 0x448   :  { %3524 = vmatmul.mubr.bf16.vlgmr.msra.gmra.mrb[32].mxu1 %v4444_v54 }
 0x449   :  { %3527 = vmatprep.mubr.bf16.mxu1 %v4454_v5  ;;  %3540 = vmatpush3.bf16.msra.mxu1 %v3989_v18 }
 0x44a   :  { %3541 = vmatprep.subr.bf16.mxu1 %v3990_v19 }
 0x44d   :  { %3542 = vmatpush3.bf16.msra.mxu1 %v3990_v19 }
 0x44e   :  { %3543 = vmatprep.subr.bf16.mxu1 %v3991_v22 }
 0x450   :  { %3528 = vmatmul.mubr.bf16.gmra.mrb[36].mxu1 %v4451_v3 }
 0x451   :  { %3531 = vmatprep.mubr.bf16.mxu1 %v4462_v25  ;;  %3544 = vmatpush3.bf16.msra.mxu1 %v3991_v22 }
 0x452   :  { %3545 = vmatprep.subr.bf16.mxu1 %v3992_v23 }
 0x455   :  { %3546 = vmatpush3.bf16.msra.mxu1 %v3992_v23 }
 0x456   :  { %3547 = vmatprep.subr.bf16.mxu1 %v3993_v26 }
 0x458   :  { %3532 = vmatmul.mubr.bf16.gmra.mrb[40].mxu1 %v4459_v24 }
 0x459   :  { %3535 = vmatprep.mubr.bf16.mxu1 %v1176_v40  ;;  %3548 = vmatpush3.bf16.msra.mxu1 %v3993_v26 }
 0x45a   :  { %3549 = vmatprep.subr.bf16.mxu1 %v3994_v47 }
 0x45d   :  { %3550 = vmatpush3.bf16.msra.mxu1 %v3994_v47 }
 0x45e   :  { %3551 = vmatprep.subr.bf16.mxu1 %v3995_v48 }
 0x460   :  { %3536 = vmatmul.mubr.bf16.gmra.mrb[44].mxu1 %v4467_v39 }
 0x461   :  { %3552 = vmatpush3.bf16.msra.mxu1 %v3995_v48 }
 0x462   :  { %3553 = vmatprep.subr.bf16.mxu1 %v3996_v49 }
 0x465   :  { %3554 = vmatpush3.bf16.msra.mxu1 %v3996_v49 }
 0x4fb   :  { %v3493_v50 = vpop.f32.mrb[16].mxu1 }
 0x4fc   :  { %v1212_v51 = vpop.f32.mrb[17].mxu1 }
 0x4fd   :  { %v3494_v52 = vpop.f32.mrb[18].mxu1 }
 0x4fe   :  { %v1276_v53 = vpack.c.bf16 %v3494_v52, %v3493_v50  ;;  %v1215_v54 = vpop.f32.mrb[19].mxu1 }
 0x4ff   :  { %v1275_v55 = vpack.c.bf16 %v1215_v54, %v1212_v51 }
 0x501   :  { %3555 = vmatprep.mubr.bf16.mxu1 %v1275_v55 }
 0x502   :  { %3556 = vmatmul.mubr.bf16.vlgmr.msra.gmra.mrb[32].mxu1 %v1276_v53 }
 0x503   :  { %v3497_v4 = vpop.f32.mrb[20].mxu1 }
 0x504   :  { %v1228_v57 = vpop.f32.mrb[21].mxu1 }
 0x505   :  { %v3498_v58 = vpop.f32.mrb[22].mxu1 }
 0x506   :  { %v1278_v56 = vpack.c.bf16 %v3498_v58, %v3497_v4  ;;  %v1231_v59 = vpop.f32.mrb[23].mxu1 }
 0x507   :  { %v1277_v60 = vpack.c.bf16 %v1231_v59, %v1228_v57 }
 0x509   :  { %3559 = vmatprep.mubr.bf16.mxu1 %v1277_v60 }
 0x50a   :  { %3560 = vmatmul.mubr.bf16.gmra.mrb[36].mxu1 %v1278_v56 }
 0x50b   :  { %v3501_v61 = vpop.f32.mrb[24].mxu1 }
 0x50c   :  { %v1244_v62 = vpop.f32.mrb[25].mxu1 }
 0x50d   :  { %v3502_v63 = vpop.f32.mrb[26].mxu1 }
 0x50e   :  { %v1280_v0 = vpack.c.bf16 %v3502_v63, %v3501_v61  ;;  %v1247_v1 = vpop.f32.mrb[27].mxu1 }
 0x50f   :  { %v1279_v2 = vpack.c.bf16 %v1247_v1, %v1244_v62 }
 0x511   :  { %3563 = vmatprep.mubr.bf16.mxu1 %v1279_v2 }
 0x512   :  { %3564 = vmatmul.mubr.bf16.gmra.mrb[40].mxu1 %v1280_v0 }
 0x513   :  { %v3505_v3 = vpop.f32.mrb[28].mxu1 }
 0x514   :  { %v1260_v5 = vpop.f32.mrb[29].mxu1 }
 0x515   :  { %v3506_v7 = vpop.f32.mrb[30].mxu1 }
 0x516   :  { %v1282_v8 = vpack.c.bf16 %v3506_v7, %v3505_v3  ;;  %v1263_v6 = vpop.f32.mrb[31].mxu1  ;;  %v3997_v3 = vld [vmem:[#allocation8 + $0xc0] sm:$0xff]   ;;  %v4521_v7 = vld [vmem:[#allocation2 + $0x8] sm:$0xff]  }
 0x517   :  { %v1281_v9 = vpack.c.bf16 %v1263_v6, %v1260_v5  ;;  %v3998_v5 = vld [vmem:[#allocation8 + $0xc8] sm:$0xff]   ;;  %v3999_v6 = vld [vmem:[#allocation8 + $0xd0] sm:$0xff]  }
 0x519   :  { %3567 = vmatprep.mubr.bf16.mxu1 %v1281_v9  ;;  %v4000_v9 = vld [vmem:[#allocation8 + $0xd8] sm:$0xff]  }
 0x51a   :  { %3568 = vmatmul.mubr.bf16.gmra.mrb[44].mxu1 %v1282_v8  ;;  %v4524_v8 = vld [vmem:[#allocation2 + $0x10] sm:$0xff]  }
 0x51b   :  { %3683 = vmatprep.mubr.bf16.mxu1 %v4041_v10  ;;  %v4527_v10 = vld [vmem:[#allocation2 + $0x18] sm:$0xff]  }
 0x5d5   :  { %v3557_v12 = vpop.f32.mrb[32].mxu1 }
 0x5d6   :  { %v1617_v14 = vadd.f32 %v3557_v12, %v2971_v11  ;;  %v1544_v16 = vpop.f32.mrb[33].mxu1  ;;  %v4001_v12 = vld [vmem:[#allocation8 + $0xe0] sm:$0xff]  }
 0x5d7   :  { %v1615_v17 = vadd.f32 %v2971_v11, %v1544_v16  ;;  %v3558_v20 = vpop.f32.mrb[34].mxu1  ;;  %v4533_v16 = vld [vmem:[#allocation2 + $0x28] sm:$0xff]  }
 0x5d8   :  { %v1618_v21 = vadd.f32 %v3558_v20, %v2971_v11  ;;  %v1547_v24 = vpop.f32.mrb[35].mxu1  ;;  %v1633_v27 = vmax.f32 %v1617_v14, 0.0  ;;  %v4002_v14 = vld [vmem:[#allocation8 + $0xe8] sm:$0xff]   ;;  %v4003_v20 = vld [vmem:[#allocation8 + $0xf0] sm:$0xff]  }
 0x5d9   :  { %v1616_v25 = vadd.f32 %v2971_v11, %v1547_v24  ;;  %v1631_v29 = vmax.f32 %v1615_v17, 0.0  ;;  %v4536_v17 = vld [vmem:[#allocation2 + $0x30] sm:$0xff]   ;;  %v4539_v24 = vld [vmem:[#allocation2 + $0x38] sm:$0xff]  }
 0x5da   :  { %v1634_v28 = vmax.f32 %v1618_v21, 0.0  ;;  %v4004_v21 = vld [vmem:[#allocation8 + $0xf8] sm:$0xff]  }
 0x5db   :  { %v1632_v30 = vmax.f32 %v1616_v25, 0.0  ;;  %v4005_v25 = vld [vmem:[#allocation7 + $0xc0] sm:$0xff]  }
 0x5dc   :  { %v4489_v31 = vpack.c.bf16 %v1634_v28, %v1633_v27  ;;  %v4006_v27 = vld [vmem:[#allocation7 + $0xc8] sm:$0xff]   ;;  %v4007_v28 = vld [vmem:[#allocation7 + $0xd0] sm:$0xff]  }
 0x5dd   :  { %v4491_v32 = vpack.c.bf16 %v1632_v30, %v1631_v29  ;;  %v3561_v33 = vpop.f32.mrb[36].mxu1  ;;  %v4008_v29 = vld [vmem:[#allocation7 + $0xd8] sm:$0xff]   ;;  %v4009_v30 = vld [vmem:[#allocation7 + $0xe0] sm:$0xff]  }
 0x5de   :  { %v1621_v34 = vadd.f32 %v3561_v33, %v2971_v11  ;;  %v1560_v35 = vpop.f32.mrb[37].mxu1  ;;  %v4010_v33 = vld [vmem:[#allocation7 + $0xe8] sm:$0xff]  }
 0x5df   :  { %v1619_v36 = vadd.f32 %v2971_v11, %v1560_v35  ;;  %v3562_v37 = vpop.f32.mrb[38].mxu1  ;;  %3571 = vmatprep.subr.bf16.mxu0 %v4491_v32  ;;  %v4012_v35 = vld [vmem:[#allocation7 + $0xf8] sm:$0xff]  }
 0x5e0   :  { %v1622_v38 = vadd.f32 %v3562_v37, %v2971_v11  ;;  %v1563_v39 = vpop.f32.mrb[39].mxu1  ;;  %3572 = vmatpush3.bf16.msra.mxu0 %v4491_v32  ;;  %v1637_v42 = vmax.f32 %v1621_v34, 0.0  ;;  %v4011_v34 = vld [vmem:[#allocation7 + $0xf0] sm:$0xff]  }
 0x5e1   :  { %v1620_v40 = vadd.f32 %v2971_v11, %v1563_v39  ;;  %3573 = vmatprep.subr.bf16.mxu0 %v4489_v31  ;;  %v1635_v43 = vmax.f32 %v1619_v36, 0.0 }
 0x5e2   :  { %v1638_v41 = vmax.f32 %v1622_v38, 0.0 }
 0x5e3   :  { %v1636_v44 = vmax.f32 %v1620_v40, 0.0 }
 0x5e4   :  { %v4496_v45 = vpack.c.bf16 %v1638_v41, %v1637_v42  ;;  %3574 = vmatpush3.bf16.msra.mxu0 %v4489_v31 }
 0x5e5   :  { %v4499_v46 = vpack.c.bf16 %v1636_v44, %v1635_v43  ;;  %v3565_v13 = vpop.f32.mrb[40].mxu1 }
 0x5e6   :  { %v1625_v15 = vadd.f32 %v3565_v13, %v2971_v11  ;;  %v1576_v18 = vpop.f32.mrb[41].mxu1 }
 0x5e7   :  { %v1623_v19 = vadd.f32 %v2971_v11, %v1576_v18  ;;  %v3566_v22 = vpop.f32.mrb[42].mxu1  ;;  %3575 = vmatprep.subr.bf16.mxu0 %v4499_v46 }
 0x5e8   :  { %v1626_v23 = vadd.f32 %v3566_v22, %v2971_v11  ;;  %v1579_v26 = vpop.f32.mrb[43].mxu1  ;;  %3576 = vmatpush3.bf16.msra.mxu0 %v4499_v46  ;;  %v1641_v48 = vmax.f32 %v1625_v15, 0.0 }
 0x5e9   :  { %v1624_v47 = vadd.f32 %v2971_v11, %v1579_v26  ;;  %3577 = vmatprep.subr.bf16.mxu0 %v4496_v45  ;;  %v1639_v50 = vmax.f32 %v1623_v19, 0.0 }
 0x5ea   :  { %v1642_v49 = vmax.f32 %v1626_v23, 0.0 }
 0x5eb   :  { %v1640_v51 = vmax.f32 %v1624_v47, 0.0 }
 0x5ec   :  { %v4504_v52 = vpack.c.bf16 %v1642_v49, %v1641_v48  ;;  %3578 = vmatpush3.bf16.msra.mxu0 %v4496_v45 }
 0x5ed   :  { %v4507_v53 = vpack.c.bf16 %v1640_v51, %v1639_v50  ;;  %v3569_v54 = vpop.f32.mrb[44].mxu1 }
 0x5ee   :  { %v1629_v55 = vadd.f32 %v3569_v54, %v2971_v11  ;;  %v1592_v4 = vpop.f32.mrb[45].mxu1 }
 0x5ef   :  { %v1627_v57 = vadd.f32 %v2971_v11, %v1592_v4  ;;  %v3570_v58 = vpop.f32.mrb[46].mxu1  ;;  %3579 = vmatprep.subr.bf16.mxu0 %v4507_v53 }
 0x5f0   :  { %v1630_v56 = vadd.f32 %v3570_v58, %v2971_v11  ;;  %v1595_v59 = vpop.f32.mrb[47].mxu1  ;;  %3580 = vmatpush3.bf16.msra.mxu0 %v4507_v53  ;;  %v1645_v61 = vmax.f32 %v1629_v55, 0.0 }
 0x5f1   :  { %v1628_v60 = vadd.f32 %v2971_v11, %v1595_v59  ;;  %3581 = vmatprep.subr.bf16.mxu0 %v4504_v52  ;;  %v1643_v63 = vmax.f32 %v1627_v57, 0.0  ;;  %v4530_v11 = vld [vmem:[#allocation2 + $0x20] sm:$0xff]   ;;  %v2110_v59 = vunpack.c.l.bf16 %v4489_v31 }
 0x5f2   :  { %v1646_v62 = vmax.f32 %v1630_v56, 0.0  ;;  %v4553_v57 = vld [vmem:[%s4701_s4 + $0x3] ss:$0 sm:$0xff] }
 0x5f3   :  { %v1644_v0 = vmax.f32 %v1628_v60, 0.0 }
 0x5f4   :  { %v4512_v1 = vpack.c.bf16 %v1646_v62, %v1645_v61  ;;  %3582 = vmatpush3.bf16.msra.mxu0 %v4504_v52  ;;  %v2108_v62 = vunpack.c.l.bf16 %v4491_v32 }
 0x5f5   :  { %v4515_v2 = vpack.c.bf16 %v1644_v0, %v1643_v63 }
 0x5f7   :  { %3583 = vmatprep.subr.bf16.mxu0 %v4515_v2 }
 0x5f8   :  { %3584 = vmatpush3.bf16.msra.mxu0 %v4515_v2 }
 0x5f9   :  { %3585 = vmatprep.subr.bf16.mxu0 %v4512_v1 }
 0x5fc   :  { %3586 = vmatpush3.bf16.msra.mxu0 %v4512_v1 }
 0x5fd   :  { %3603 = vmatprep.subr.bf16.mxu0 %v3997_v3 }
 0x5ff   :  { %3588 = vmatmul.mubr.bf16.vlgmr.msra.gmra.mrb[48].mxu0 %v4521_v7 }
 0x600   :  { %3604 = vmatpush3.bf16.msra.mxu0 %v3997_v3  ;;  %3591 = vmatprep.mubr.bf16.mxu0 %v4524_v8 }
 0x601   :  { %3605 = vmatprep.subr.bf16.mxu0 %v3998_v5 }
 0x604   :  { %3606 = vmatpush3.bf16.msra.mxu0 %v3998_v5  ;;  %v2111_v5 = vunpack.c.h.bf16 %v4489_v31 }
 0x605   :  { %3607 = vmatprep.subr.bf16.mxu0 %v3999_v6 }
 0x607   :  { %3592 = vmatmul.mubr.bf16.gmra.mrb[52].mxu0 %v4527_v10 }
 0x608   :  { %3608 = vmatpush3.bf16.msra.mxu0 %v3999_v6  ;;  %3595 = vmatprep.mubr.bf16.mxu0 %v4530_v11 }
 0x609   :  { %3609 = vmatprep.subr.bf16.mxu0 %v4000_v9 }
 0x60c   :  { %3610 = vmatpush3.bf16.msra.mxu0 %v4000_v9 }
 0x60d   :  { %3611 = vmatprep.subr.bf16.mxu0 %v4001_v12 }
 0x60f   :  { %3596 = vmatmul.mubr.bf16.gmra.mrb[56].mxu0 %v4533_v16 }
 0x610   :  { %3612 = vmatpush3.bf16.msra.mxu0 %v4001_v12  ;;  %3599 = vmatprep.mubr.bf16.mxu0 %v4536_v17 }
 0x611   :  { %3613 = vmatprep.subr.bf16.mxu0 %v4002_v14 }
 0x614   :  { %3614 = vmatpush3.bf16.msra.mxu0 %v4002_v14  ;;  %v2109_v14 = vunpack.c.h.bf16 %v4491_v32 }
 0x615   :  { %3615 = vmatprep.subr.bf16.mxu0 %v4003_v20 }
 0x617   :  { %3600 = vmatmul.mubr.bf16.gmra.mrb[60].mxu0 %v4539_v24 }
 0x618   :  { %3616 = vmatpush3.bf16.msra.mxu0 %v4003_v20  ;;  %3619 = vmatprep.mubr.bf16.mxu0 %v4491_v32  ;;  %v2112_v32 = vunpack.c.l.bf16 %v4499_v46 }
 0x619   :  { %3617 = vmatprep.subr.bf16.mxu0 %v4004_v21 }
 0x61c   :  { %3618 = vmatpush3.bf16.msra.mxu0 %v4004_v21 }
 0x61d   :  { %3635 = vmatprep.subr.bf16.mxu0 %v4005_v25 }
 0x61f   :  { %3620 = vmatmul.mubr.bf16.vlgmr.msra.gmra.mrb[64].mxu0 %v4489_v31 }
 0x620   :  { %3623 = vmatprep.mubr.bf16.mxu0 %v4499_v46  ;;  %3636 = vmatpush3.bf16.msra.mxu0 %v4005_v25 }
 0x621   :  { %3637 = vmatprep.subr.bf16.mxu0 %v4006_v27 }
 0x624   :  { %3638 = vmatpush3.bf16.msra.mxu0 %v4006_v27 }
 0x625   :  { %3639 = vmatprep.subr.bf16.mxu0 %v4007_v28 }
 0x627   :  { %3624 = vmatmul.mubr.bf16.gmra.mrb[68].mxu0 %v4496_v45 }
 0x628   :  { %3627 = vmatprep.mubr.bf16.mxu0 %v4507_v53  ;;  %3640 = vmatpush3.bf16.msra.mxu0 %v4007_v28 }
 0x629   :  { %3641 = vmatprep.subr.bf16.mxu0 %v4008_v29 }
 0x62c   :  { %3642 = vmatpush3.bf16.msra.mxu0 %v4008_v29 }
 0x62d   :  { %3643 = vmatprep.subr.bf16.mxu0 %v4009_v30 }
 0x62f   :  { %3628 = vmatmul.mubr.bf16.gmra.mrb[72].mxu0 %v4504_v52 }
 0x630   :  { %3631 = vmatprep.mubr.bf16.mxu0 %v4515_v2  ;;  %3644 = vmatpush3.bf16.msra.mxu0 %v4009_v30 }
 0x631   :  { %3645 = vmatprep.subr.bf16.mxu0 %v4010_v33 }
 0x634   :  { %3646 = vmatpush3.bf16.msra.mxu0 %v4010_v33 }
 0x635   :  { %3647 = vmatprep.subr.bf16.mxu0 %v4011_v34 }
 0x637   :  { %3632 = vmatmul.mubr.bf16.gmra.mrb[76].mxu0 %v4512_v1 }
 0x638   :  { %3648 = vmatpush3.bf16.msra.mxu0 %v4011_v34 }
 0x639   :  { %3649 = vmatprep.subr.bf16.mxu0 %v4012_v35 }
 0x63c   :  { %3650 = vmatpush3.bf16.msra.mxu0 %v4012_v35  ;;  %v2114_v35 = vunpack.c.l.bf16 %v4496_v45 }
 0x6d2   :  { %v3589_v36 = vpop.f32.mrb[48].mxu0 }
 0x6d3   :  { %v1689_v37 = vpop.f32.mrb[49].mxu0 }
 0x6d4   :  { %v3590_v38 = vpop.f32.mrb[50].mxu0 }
 0x6d5   :  { %v1753_v39 = vpack.c.bf16 %v3590_v38, %v3589_v36  ;;  %v1692_v40 = vpop.f32.mrb[51].mxu0 }
 0x6d6   :  { %v1752_v42 = vpack.c.bf16 %v1692_v40, %v1689_v37 }
 0x6d8   :  { %3651 = vmatprep.mubr.bf16.mxu0 %v1752_v42  ;;  %v2115_v42 = vunpack.c.h.bf16 %v4496_v45 }
 0x6d9   :  { %3652 = vmatmul.mubr.bf16.vlgmr.msra.gmra.mrb[64].mxu0 %v1753_v39 }
 0x6da   :  { %v3593_v41 = vpop.f32.mrb[52].mxu0 }
 0x6db   :  { %v1705_v43 = vpop.f32.mrb[53].mxu0 }
 0x6dc   :  { %v3594_v44 = vpop.f32.mrb[54].mxu0 }
 0x6dd   :  { %v1755_v13 = vpack.c.bf16 %v3594_v44, %v3593_v41  ;;  %v1708_v15 = vpop.f32.mrb[55].mxu0 }
 0x6de   :  { %v1754_v18 = vpack.c.bf16 %v1708_v15, %v1705_v43 }
 0x6e0   :  { %3655 = vmatprep.mubr.bf16.mxu0 %v1754_v18 }
 0x6e1   :  { %3656 = vmatmul.mubr.bf16.gmra.mrb[68].mxu0 %v1755_v13  ;;  %v2113_v13 = vunpack.c.h.bf16 %v4499_v46 }
 0x6e2   :  { %v3597_v19 = vpop.f32.mrb[56].mxu0 }
 0x6e3   :  { %v1721_v22 = vpop.f32.mrb[57].mxu0 }
 0x6e4   :  { %v3598_v23 = vpop.f32.mrb[58].mxu0 }
 0x6e5   :  { %v1757_v26 = vpack.c.bf16 %v3598_v23, %v3597_v19  ;;  %v1724_v47 = vpop.f32.mrb[59].mxu0 }
 0x6e6   :  { %v1756_v48 = vpack.c.bf16 %v1724_v47, %v1721_v22 }
 0x6e8   :  { %3659 = vmatprep.mubr.bf16.mxu0 %v1756_v48 }
 0x6e9   :  { %3660 = vmatmul.mubr.bf16.gmra.mrb[72].mxu0 %v1757_v26 }
 0x6ea   :  { %v3601_v49 = vpop.f32.mrb[60].mxu0 }
 0x6eb   :  { %v1737_v50 = vpop.f32.mrb[61].mxu0 }
 0x6ec   :  { %v3602_v51 = vpop.f32.mrb[62].mxu0 }
 0x6ed   :  { %v1759_v54 = vpack.c.bf16 %v3602_v51, %v3601_v49  ;;  %v1740_v55 = vpop.f32.mrb[63].mxu0  ;;  %v2118_v49 = vunpack.c.l.bf16 %v4504_v52 }
 0x6ee   :  { %v1758_v4 = vpack.c.bf16 %v1740_v55, %v1737_v50 }
 0x6f0   :  { %3663 = vmatprep.mubr.bf16.mxu0 %v1758_v4 }
 0x6f1   :  { %3664 = vmatmul.mubr.bf16.gmra.mrb[76].mxu0 %v1759_v54  ;;  %v2116_v54 = vunpack.c.l.bf16 %v4507_v53 }
 0x7ac   :  { %v3653_v58 = vpop.f32.mrb[64].mxu0 }
 0x7ad   :  { %v2094_v56 = vadd.f32 %v3653_v58, %v4553_v57  ;;  %v2021_v60 = vpop.f32.mrb[65].mxu0 }
 0x7ae   :  { %v2092_v61 = vadd.f32 %v4553_v57, %v2021_v60  ;;  %v3654_v63 = vpop.f32.mrb[66].mxu0 }
 0x7af   :  { %v2126_v0 = vadd.f32 %v2110_v59, %v2094_v56  ;;  %v2095_v3 = vadd.f32 %v3654_v63, %v4553_v57  ;;  %v2024_v6 = vpop.f32.mrb[67].mxu0  ;;  %v2119_v56 = vunpack.c.h.bf16 %v4504_v52 }
 0x7b0   :  { %v2124_v9 = vadd.f32 %v2108_v62, %v2092_v61  ;;  %v2093_v12 = vadd.f32 %v4553_v57, %v2024_v6  ;;  %v2117_v62 = vunpack.c.h.bf16 %v4507_v53 }
 0x7b1   :  { %v2127_v20 = vadd.f32 %v2111_v5, %v2095_v3  ;;  %v2142_v25 = vmax.f32 %v2126_v0, 0.0 }
 0x7b2   :  { %v2125_v21 = vadd.f32 %v2109_v14, %v2093_v12  ;;  %v2140_v28 = vmax.f32 %v2124_v9, 0.0 }
 0x7b3   :  { %v2143_v27 = vmax.f32 %v2127_v20, 0.0  ;;  %v2122_v20 = vunpack.c.l.bf16 %v4512_v1 }
 0x7b4   :  { %v2141_v29 = vmax.f32 %v2125_v21, 0.0  ;;  %v3657_v30 = vpop.f32.mrb[68].mxu0 }
 0x7b5   :  { %v4563_v33 = vpack.c.bf16 %v2143_v27, %v2142_v25  ;;  %v2098_v34 = vadd.f32 %v3657_v30, %v4553_v57  ;;  %v2037_v31 = vpop.f32.mrb[69].mxu0  ;;  %v2120_v27 = vunpack.c.l.bf16 %v4515_v2 }
 0x7b6   :  { %v4567_v36 = vpack.c.bf16 %v2141_v29, %v2140_v28  ;;  %v2096_v37 = vadd.f32 %v4553_v57, %v2037_v31  ;;  %v3658_v38 = vpop.f32.mrb[70].mxu0 }
 0x7b7   :  { %v2130_v39 = vadd.f32 %v2114_v35, %v2098_v34  ;;  %v2099_v40 = vadd.f32 %v3658_v38, %v4553_v57  ;;  %v2040_v41 = vpop.f32.mrb[71].mxu0  ;;  %v2123_v34 = vunpack.c.h.bf16 %v4512_v1 }
 0x7b8   :  { %v2128_v43 = vadd.f32 %v2112_v32, %v2096_v37  ;;  %v2097_v44 = vadd.f32 %v4553_v57, %v2040_v41  ;;  %3667 = vmatprep.subr.bf16.mxu1 %v4567_v36  ;;  %v2121_v32 = vunpack.c.h.bf16 %v4515_v2  ;;  %v4013_v2 = vld [vmem:[#allocation8 + $0x100] sm:$0xff]  }
 0x7b9   :  { %v2131_v15 = vadd.f32 %v2115_v42, %v2099_v40  ;;  %3668 = vmatpush3.bf16.msra.mxu1 %v4567_v36  ;;  %v2146_v19 = vmax.f32 %v2130_v39, 0.0 }
 0x7ba   :  { %v2129_v18 = vadd.f32 %v2113_v13, %v2097_v44  ;;  %3669 = vmatprep.subr.bf16.mxu1 %v4563_v33  ;;  %v2144_v23 = vmax.f32 %v2128_v43, 0.0  ;;  %v4015_v13 = vld [vmem:[#allocation8 + $0x110] sm:$0xff]  }
 0x7bb   :  { %v2147_v22 = vmax.f32 %v2131_v15, 0.0  ;;  %v4016_v15 = vld [vmem:[#allocation8 + $0x118] sm:$0xff]  }
 0x7bc   :  { %v2145_v26 = vmax.f32 %v2129_v18, 0.0  ;;  %v3661_v47 = vpop.f32.mrb[72].mxu0  ;;  %v4017_v18 = vld [vmem:[#allocation8 + $0x120] sm:$0xff]  }
 0x7bd   :  { %v4578_v45 = vpack.c.bf16 %v2147_v22, %v2146_v19  ;;  %v2102_v48 = vadd.f32 %v3661_v47, %v4553_v57  ;;  %v2053_v46 = vpop.f32.mrb[73].mxu0  ;;  %3670 = vmatpush3.bf16.msra.mxu1 %v4563_v33  ;;  %v4018_v19 = vld [vmem:[#allocation8 + $0x128] sm:$0xff]  }
 0x7be   :  { %v4583_v50 = vpack.c.bf16 %v2145_v26, %v2144_v23  ;;  %v2100_v51 = vadd.f32 %v4553_v57, %v2053_v46  ;;  %v3662_v55 = vpop.f32.mrb[74].mxu0  ;;  %v4026_v22 = vld [vmem:[#allocation7 + $0x128] sm:$0xff]   ;;  %v4027_v23 = vld [vmem:[#allocation7 + $0x130] sm:$0xff]   ;;  %v4028_v26 = vld [vmem:[#allocation7 + $0x138] sm:$0xff]  }
 0x7bf   :  { %v2134_v4 = vadd.f32 %v2118_v49, %v2102_v48  ;;  %v2103_v58 = vadd.f32 %v3662_v55, %v4553_v57  ;;  %v2056_v59 = vpop.f32.mrb[75].mxu0 }
 0x7c0   :  { %v2132_v60 = vadd.f32 %v2116_v54, %v2100_v51  ;;  %v2101_v61 = vadd.f32 %v4553_v57, %v2056_v59  ;;  %3671 = vmatprep.subr.bf16.mxu1 %v4583_v50 }
 0x7c1   :  { %v2135_v63 = vadd.f32 %v2119_v56, %v2103_v58  ;;  %3672 = vmatpush3.bf16.msra.mxu1 %v4583_v50  ;;  %v2150_v3 = vmax.f32 %v2134_v4, 0.0 }
 0x7c2   :  { %v2133_v0 = vadd.f32 %v2117_v62, %v2101_v61  ;;  %3673 = vmatprep.subr.bf16.mxu1 %v4578_v45  ;;  %v2148_v6 = vmax.f32 %v2132_v60, 0.0 }
 0x7c3   :  { %v2151_v5 = vmax.f32 %v2135_v63, 0.0 }
 0x7c4   :  { %v2149_v9 = vmax.f32 %v2133_v0, 0.0  ;;  %v3665_v12 = vpop.f32.mrb[76].mxu0 }
 0x7c5   :  { %v4594_v52 = vpack.c.bf16 %v2151_v5, %v2150_v3  ;;  %v2106_v14 = vadd.f32 %v3665_v12, %v4553_v57  ;;  %v2069_v53 = vpop.f32.mrb[77].mxu0  ;;  %3674 = vmatpush3.bf16.msra.mxu1 %v4578_v45 }
 0x7c6   :  { %v4599_v21 = vpack.c.bf16 %v2149_v9, %v2148_v6  ;;  %v2104_v25 = vadd.f32 %v4553_v57, %v2069_v53  ;;  %v3666_v28 = vpop.f32.mrb[78].mxu0 }
 0x7c7   :  { %v2138_v29 = vadd.f32 %v2122_v20, %v2106_v14  ;;  %v2107_v30 = vadd.f32 %v3666_v28, %v4553_v57  ;;  %v2072_v35 = vpop.f32.mrb[79].mxu0  ;;  %v4029_v28 = vld [vmem:[#allocation10] sm:$0xff]  }
 0x7c8   :  { %v2136_v31 = vadd.f32 %v2120_v27, %v2104_v25  ;;  %v2105_v37 = vadd.f32 %v4553_v57, %v2072_v35  ;;  %3675 = vmatprep.subr.bf16.mxu1 %v4599_v21  ;;  %v4014_v57 = vld [vmem:[#allocation8 + $0x108] sm:$0xff]   ;;  %v4196_v25 = vmov 0.0|0.0   ;;  %v4198_v27 = vmov 0.0   ;;  %v4033_v35 = vld [vmem:[#allocation10 + $0x20] sm:$0xff]  }
 0x7c9   :  { %v2139_v38 = vadd.f32 %v2123_v34, %v2107_v30  ;;  %3676 = vmatpush3.bf16.msra.mxu1 %v4599_v21  ;;  %v2154_v40 = vmax.f32 %v2138_v29, 0.0  ;;  %3798 = vmatprep.subr.bf16.mxu0 %v4198_v27  ;;  %v4030_v29 = vld [vmem:[#allocation10 + $0x8] sm:$0xff]   ;;  %v4031_v30 = vld [vmem:[#allocation10 + $0x10] sm:$0xff]   ;;  %v4032_v34 = vld [vmem:[#allocation10 + $0x18] sm:$0xff]  }
 0x7ca   :  { %v2137_v39 = vadd.f32 %v2121_v32, %v2105_v37  ;;  %3677 = vmatprep.subr.bf16.mxu1 %v4594_v52  ;;  %v2152_v41 = vmax.f32 %v2136_v31, 0.0  ;;  %3814 = vmatprep.mubr.msk.bf16.mxu0 %vm4197_vm0, %v4198_v27  ;;  %v4034_v31 = vld [vmem:[#allocation10 + $0x28] sm:$0xff]   ;;  %v4035_v37 = vld [vmem:[#allocation10 + $0x30] sm:$0xff]   ;;  %v4638_v32 = vld [vmem:[%s4701_s4 + $0x4] ss:$0 sm:$0xff] }
 0x7cb   :  { %v2155_v42 = vmax.f32 %v2139_v38, 0.0  ;;  %3799 = vmatpush3.bf16.msra.mxu0 %v4029_v28 }
 0x7cc   :  { %v2153_v43 = vmax.f32 %v2137_v39, 0.0  ;;  %3800 = vmatprep.subr.bf16.mxu0 %v4198_v27 }
 0x7cd   :  { %v4610_v44 = vpack.c.bf16 %v2155_v42, %v2154_v40  ;;  %3678 = vmatpush3.bf16.msra.mxu1 %v4594_v52  ;;  %v2619_v40 = vunpack.c.l.bf16 %v4563_v33 }
 0x7ce   :  { %v4613_v1 = vpack.c.bf16 %v2153_v43, %v2152_v41  ;;  %v2617_v43 = vunpack.c.l.bf16 %v4567_v36 }
 0x7cf   :  { %3801 = vmatpush3.bf16.msra.mxu0 %v4030_v29 }
 0x7d0   :  { %3679 = vmatprep.subr.bf16.mxu1 %v4613_v1  ;;  %3802 = vmatprep.subr.bf16.mxu0 %v4198_v27 }
 0x7d1   :  { %3680 = vmatpush3.bf16.msra.mxu1 %v4613_v1 }
 0x7d2   :  { %3681 = vmatprep.subr.bf16.mxu1 %v4610_v44 }
 0x7d3   :  { %3803 = vmatpush3.bf16.msra.mxu0 %v4031_v30  ;;  %v2628_v30 = vunpack.c.h.bf16 %v4594_v52 }
 0x7d4   :  { %3804 = vmatprep.subr.bf16.mxu0 %v4198_v27 }
 0x7d5   :  { %3682 = vmatpush3.bf16.msra.mxu1 %v4610_v44 }
 0x7d6   :  { %3699 = vmatprep.subr.bf16.mxu1 %v4013_v2 }
 0x7d7   :  { %3805 = vmatpush3.bf16.msra.mxu0 %v4032_v34 }
 0x7d8   :  { %3684 = vmatmul.mubr.bf16.vlgmr.msra.gmra.mrb[48].mxu1 %v4521_v7  ;;  %v4019_v7 = vld [vmem:[#allocation8 + $0x130] sm:$0xff]   ;;  %3806 = vmatprep.subr.bf16.mxu0 %v4198_v27 }
 0x7d9   :  { %3700 = vmatpush3.bf16.msra.mxu1 %v4013_v2  ;;  %3687 = vmatprep.mubr.bf16.mxu1 %v4524_v8  ;;  %v4020_v8 = vld [vmem:[#allocation8 + $0x138] sm:$0xff]  }
 0x7da   :  { %3701 = vmatprep.subr.bf16.mxu1 %v4014_v57 }
 0x7db   :  { %3807 = vmatpush3.bf16.msra.mxu0 %v4033_v35 }
 0x7dc   :  { %3808 = vmatprep.subr.bf16.mxu0 %v4198_v27 }
 0x7dd   :  { %3702 = vmatpush3.bf16.msra.mxu1 %v4014_v57 }
 0x7de   :  { %3703 = vmatprep.subr.bf16.mxu1 %v4015_v13 }
 0x7df   :  { %3809 = vmatpush3.bf16.msra.mxu0 %v4034_v31 }
 0x7e0   :  { %3688 = vmatmul.mubr.bf16.gmra.mrb[52].mxu1 %v4527_v10  ;;  %v4021_v10 = vld [vmem:[#allocation7 + $0x100] sm:$0xff]   ;;  %3810 = vmatprep.subr.bf16.mxu0 %v4198_v27 }
 0x7e1   :  { %3704 = vmatpush3.bf16.msra.mxu1 %v4015_v13  ;;  %3691 = vmatprep.mubr.bf16.mxu1 %v4530_v11  ;;  %v4022_v11 = vld [vmem:[#allocation7 + $0x108] sm:$0xff]  }
 0x7e2   :  { %3705 = vmatprep.subr.bf16.mxu1 %v4016_v15 }
 0x7e3   :  { %3811 = vmatpush3.bf16.msra.mxu0 %v4035_v37  ;;  %v2626_v37 = vunpack.c.h.bf16 %v4599_v21 }
 0x7e4   :  { %3812 = vmatprep.subr.bf16.mxu0 %v4198_v27 }
 0x7e5   :  { %3706 = vmatpush3.bf16.msra.mxu1 %v4016_v15  ;;  %v2620_v15 = vunpack.c.h.bf16 %v4563_v33 }
 0x7e6   :  { %3707 = vmatprep.subr.bf16.mxu1 %v4017_v18 }
 0x7e8   :  { %3692 = vmatmul.mubr.bf16.gmra.mrb[56].mxu1 %v4533_v16  ;;  %v4023_v16 = vld [vmem:[#allocation7 + $0x110] sm:$0xff]  }
 0x7e9   :  { %3708 = vmatpush3.bf16.msra.mxu1 %v4017_v18  ;;  %3695 = vmatprep.mubr.bf16.mxu1 %v4536_v17  ;;  %v4024_v17 = vld [vmem:[#allocation7 + $0x118] sm:$0xff]  }
 0x7ea   :  { %3709 = vmatprep.subr.bf16.mxu1 %v4018_v19 }
 0x7ed   :  { %3710 = vmatpush3.bf16.msra.mxu1 %v4018_v19 }
 0x7ee   :  { %3711 = vmatprep.subr.bf16.mxu1 %v4019_v7 }
 0x7f0   :  { %3696 = vmatmul.mubr.bf16.gmra.mrb[60].mxu1 %v4539_v24  ;;  %v4025_v24 = vld [vmem:[#allocation7 + $0x120] sm:$0xff]  }
 0x7f1   :  { %3712 = vmatpush3.bf16.msra.mxu1 %v4019_v7  ;;  %3715 = vmatprep.mubr.bf16.mxu1 %v4567_v36 }
 0x7f2   :  { %3713 = vmatprep.subr.bf16.mxu1 %v4020_v8 }
 0x7f5   :  { %3714 = vmatpush3.bf16.msra.mxu1 %v4020_v8  ;;  %v2618_v8 = vunpack.c.h.bf16 %v4567_v36 }
 0x7f6   :  { %3731 = vmatprep.subr.bf16.mxu1 %v4021_v10 }
 0x7f8   :  { %3716 = vmatmul.mubr.bf16.vlgmr.msra.gmra.mrb[64].mxu1 %v4563_v33 }
 0x7f9   :  { %3719 = vmatprep.mubr.bf16.mxu1 %v4583_v50  ;;  %3732 = vmatpush3.bf16.msra.mxu1 %v4021_v10 }
 0x7fa   :  { %3733 = vmatprep.subr.bf16.mxu1 %v4022_v11 }
 0x7fd   :  { %3734 = vmatpush3.bf16.msra.mxu1 %v4022_v11 }
 0x7fe   :  { %3735 = vmatprep.subr.bf16.mxu1 %v4023_v16 }
 0x800   :  { %3720 = vmatmul.mubr.bf16.gmra.mrb[68].mxu1 %v4578_v45 }
 0x801   :  { %3723 = vmatprep.mubr.bf16.mxu1 %v4599_v21  ;;  %3736 = vmatpush3.bf16.msra.mxu1 %v4023_v16 }
 0x802   :  { %3737 = vmatprep.subr.bf16.mxu1 %v4024_v17 }
 0x805   :  { %3738 = vmatpush3.bf16.msra.mxu1 %v4024_v17 }
 0x806   :  { %3739 = vmatprep.subr.bf16.mxu1 %v4025_v24 }
 0x808   :  { %3724 = vmatmul.mubr.bf16.gmra.mrb[72].mxu1 %v4594_v52 }
 0x809   :  { %3727 = vmatprep.mubr.bf16.mxu1 %v4613_v1  ;;  %3740 = vmatpush3.bf16.msra.mxu1 %v4025_v24 }
 0x80a   :  { %3741 = vmatprep.subr.bf16.mxu1 %v4026_v22 }
 0x80d   :  { %3742 = vmatpush3.bf16.msra.mxu1 %v4026_v22 }
 0x80e   :  { %3743 = vmatprep.subr.bf16.mxu1 %v4027_v23 }
 0x810   :  { %3728 = vmatmul.mubr.bf16.gmra.mrb[76].mxu1 %v4610_v44 }
 0x811   :  { %3744 = vmatpush3.bf16.msra.mxu1 %v4027_v23 }
 0x812   :  { %3745 = vmatprep.subr.bf16.mxu1 %v4028_v26 }
 0x815   :  { %3746 = vmatpush3.bf16.msra.mxu1 %v4028_v26 }
 0x816   :  { %3818 = vmatprep.subr.bf16.mxu1 %v4196_v25 }
 0x8ab   :  { %v3685_v47 = vpop.f32.mrb[48].mxu1 }
 0x8ac   :  { %v2198_v48 = vpop.f32.mrb[49].mxu1 }
 0x8ad   :  { %v3686_v49 = vpop.f32.mrb[50].mxu1 }
 0x8ae   :  { %v2262_v46 = vpack.c.bf16 %v3686_v49, %v3685_v47  ;;  %v2201_v51 = vpop.f32.mrb[51].mxu1 }
 0x8af   :  { %v2261_v54 = vpack.c.bf16 %v2201_v51, %v2198_v48  ;;  %v2623_v48 = vunpack.c.l.bf16 %v4578_v45  ;;  %v2621_v51 = vunpack.c.l.bf16 %v4583_v50 }
 0x8b1   :  { %3747 = vmatprep.mubr.bf16.mxu1 %v2261_v54 }
 0x8b2   :  { %3748 = vmatmul.mubr.bf16.vlgmr.msra.gmra.mrb[64].mxu1 %v2262_v46 }
 0x8b3   :  { %v3689_v55 = vpop.f32.mrb[52].mxu1 }
 0x8b4   :  { %v2214_v4 = vpop.f32.mrb[53].mxu1 }
 0x8b5   :  { %v3690_v58 = vpop.f32.mrb[54].mxu1 }
 0x8b6   :  { %v2264_v56 = vpack.c.bf16 %v3690_v58, %v3689_v55  ;;  %v2217_v59 = vpop.f32.mrb[55].mxu1 }
 0x8b7   :  { %v2263_v60 = vpack.c.bf16 %v2217_v59, %v2214_v4  ;;  %v2624_v4 = vunpack.c.h.bf16 %v4578_v45 }
 0x8b9   :  { %3751 = vmatprep.mubr.bf16.mxu1 %v2263_v60  ;;  %v2622_v60 = vunpack.c.h.bf16 %v4583_v50 }
 0x8ba   :  { %3752 = vmatmul.mubr.bf16.gmra.mrb[68].mxu1 %v2264_v56 }
 0x8bb   :  { %v3693_v61 = vpop.f32.mrb[56].mxu1 }
 0x8bc   :  { %v2230_v62 = vpop.f32.mrb[57].mxu1 }
 0x8bd   :  { %v3694_v63 = vpop.f32.mrb[58].mxu1 }
 0x8be   :  { %v2266_v0 = vpack.c.bf16 %v3694_v63, %v3693_v61  ;;  %v2233_v3 = vpop.f32.mrb[59].mxu1 }
 0x8bf   :  { %v2265_v5 = vpack.c.bf16 %v2233_v3, %v2230_v62 }
 0x8c1   :  { %3755 = vmatprep.mubr.bf16.mxu1 %v2265_v5 }
 0x8c2   :  { %3756 = vmatmul.mubr.bf16.gmra.mrb[72].mxu1 %v2266_v0 }
 0x8c3   :  { %v3697_v6 = vpop.f32.mrb[60].mxu1 }
 0x8c4   :  { %v2246_v9 = vpop.f32.mrb[61].mxu1 }
 0x8c5   :  { %v3698_v12 = vpop.f32.mrb[62].mxu1 }
 0x8c6   :  { %v2268_v14 = vpack.c.bf16 %v3698_v12, %v3697_v6  ;;  %v2249_v20 = vpop.f32.mrb[63].mxu1  ;;  %v2627_v12 = vunpack.c.l.bf16 %v4594_v52 }
 0x8c7   :  { %v2267_v53 = vpack.c.bf16 %v2249_v20, %v2246_v9 }
 0x8c9   :  { %3759 = vmatprep.mubr.bf16.mxu1 %v2267_v53  ;;  %v2625_v53 = vunpack.c.l.bf16 %v4599_v21 }
 0x8ca   :  { %3760 = vmatmul.mubr.bf16.gmra.mrb[76].mxu1 %v2268_v14 }
 0x8cb   :  { %3795 = vmatprep.mubr.msk.f32.mxu1 %vm4197_vm0, %v4198_v27 }
 0x985   :  { %v3749_v38 = vpop.f32.mrb[64].mxu1 }
 0x986   :  { %v2603_v39 = vadd.f32 %v3749_v38, %v4638_v32  ;;  %v2530_v42 = vpop.f32.mrb[65].mxu1 }
 0x987   :  { %v2601_v41 = vadd.f32 %v4638_v32, %v2530_v42  ;;  %v3750_v2 = vpop.f32.mrb[66].mxu1 }
 0x988   :  { %v2635_v57 = vadd.f32 %v2619_v40, %v2603_v39  ;;  %v2604_v13 = vadd.f32 %v3750_v2, %v4638_v32  ;;  %v2533_v18 = vpop.f32.mrb[67].mxu1 }
 0x989   :  { %v2633_v19 = vadd.f32 %v2617_v43, %v2601_v41  ;;  %v2602_v7 = vadd.f32 %v4638_v32, %v2533_v18 }
 0x98a   :  { %v2636_v10 = vadd.f32 %v2620_v15, %v2604_v13  ;;  %v2651_v16 = vmax.f32 %v2635_v57, 0.0  ;;  %v2631_v13 = vunpack.c.l.bf16 %v4610_v44 }
 0x98b   :  { %v2634_v11 = vadd.f32 %v2618_v8, %v2602_v7  ;;  %v2649_v24 = vmax.f32 %v2633_v19, 0.0  ;;  %v2629_v19 = vunpack.c.l.bf16 %v4613_v1 }
 0x98c   :  { %v2652_v17 = vmax.f32 %v2636_v10, 0.0 }
 0x98d   :  { %v2650_v22 = vmax.f32 %v2634_v11, 0.0  ;;  %v3753_v23 = vpop.f32.mrb[68].mxu1  ;;  %v2632_v11 = vunpack.c.h.bf16 %v4610_v44 }
 0x98e   :  { %v2666_v26 = vpack.c.bf16 %v2652_v17, %v2651_v16  ;;  %v2607_v47 = vadd.f32 %v3753_v23, %v4638_v32  ;;  %v2546_v49 = vpop.f32.mrb[69].mxu1 }
 0x98f   :  { %v2665_v33 = vpack.c.bf16 %v2650_v22, %v2649_v24  ;;  %v2605_v46 = vadd.f32 %v4638_v32, %v2546_v49  ;;  %v3754_v54 = vpop.f32.mrb[70].mxu1  ;;  %v2630_v22 = vunpack.c.h.bf16 %v4613_v1  ;;  %v2673_v1 = vld [vmem:[%s4702_s5] sm:$0xff]  ;;  %s4199_s5 = smov [#allocation11]  }
 0x990   :  { %v2639_v36 = vadd.f32 %v2623_v48, %v2607_v47  ;;  %v2608_v55 = vadd.f32 %v3754_v54, %v4638_v32  ;;  %v2549_v58 = vpop.f32.mrb[71].mxu1  ;;  %s2892_s0 = sshll.u32 %s4199_s5, 4  ;;  %s2893_s0 = int_to_ptr.vmem [resolvable:$true] %s2892_s0 }
 0x991   :  { %v2637_v56 = vadd.f32 %v2621_v51, %v2605_v46  ;;  %v2606_v59 = vadd.f32 %v4638_v32, %v2549_v58  ;;  %3820 = vmatpush3.bf16.msra.mxu1 %v2665_v33  ;;  %v3008_v58 = vld [vmem:[%s4704_s7] ss:$0 sm:$0xff]  ;;  %s4159_s7 = scalar_lea.vmem %s2893_s0, 128  ;;  %p4164_p13 = scmp.lt.s32.totalorder %s2893_s0, %s2893_s0 }
 0x992   :  { %v2640_v61 = vadd.f32 %v2624_v4, %v2608_v55  ;;  %3821 = vmatprep.subr.bf16.mxu1 %v4196_v25  ;;  %v2655_v63 = vmax.f32 %v2639_v36, 0.0  ;;  %v2872_v55 = vlaneseq  ;;  %p4160_p12 = scmp.ne.s32.totalorder %s2893_s0, %s4159_s7  ;;  %p4165_p0 = scmp.lt.s32.totalorder %s4159_s7, %s4159_s7 }
 0x993   :  { %v2638_v62 = vadd.f32 %v2622_v60, %v2606_v59  ;;  %v2653_v3 = vmax.f32 %v2637_v56, 0.0 }
 0x994   :  { %v2656_v0 = vmax.f32 %v2640_v61, 0.0  ;;  %v2873_v4 = vand.u32 127, %v2872_v55  ;;  %p4166_p1 = por %p4165_p0, %p4164_p13 }
 0x995   :  { %v2654_v5 = vmax.f32 %v2638_v62, 0.0  ;;  %v3757_v6 = vpop.f32.mrb[72].mxu1  ;;  %3823 = vmatpush3.bf16.msra.mxu1 %v2666_v26 }
 0x996   :  { %v2668_v9 = vpack.c.bf16 %v2656_v0, %v2655_v63  ;;  %v2611_v45 = vadd.f32 %v3757_v6, %v4638_v32  ;;  %v2562_v14 = vpop.f32.mrb[73].mxu1  ;;  %3824 = vmatprep.subr.bf16.mxu1 %v4196_v25  ;;  %vm2874_vm1 = vcmp.lt.s32.totalorder %v2873_v4, 32  ;;  %p4167_p2 = pnand %p4166_p1, %p4160_p12 }
 0x997   :  { %v2667_v50 = vpack.c.bf16 %v2654_v5, %v2653_v3  ;;  %v2609_v20 = vadd.f32 %v4638_v32, %v2562_v14  ;;  %v3758_v27 = vpop.f32.mrb[74].mxu1 }
 0x998   :  { %v2643_v28 = vadd.f32 %v2627_v12, %v2611_v45  ;;  %v2612_v29 = vadd.f32 %v3758_v27, %v4638_v32  ;;  %v2565_v34 = vpop.f32.mrb[75].mxu1 }
 0x999   :  { %v2641_v35 = vadd.f32 %v2625_v53, %v2609_v20  ;;  %v2610_v31 = vadd.f32 %v4638_v32, %v2565_v34  ;;  %3826 = vmatpush3.bf16.msra.mxu1 %v2667_v50 }
 0x99a   :  { %v2644_v38 = vadd.f32 %v2628_v30, %v2612_v29  ;;  %3827 = vmatprep.subr.bf16.mxu1 %v4196_v25  ;;  %v2659_v40 = vmax.f32 %v2643_v28, 0.0 }
 0x99b   :  { %v2642_v39 = vadd.f32 %v2626_v37, %v2610_v31  ;;  %v2657_v41 = vmax.f32 %v2641_v35, 0.0 }
 0x99c   :  { %v2660_v42 = vmax.f32 %v2644_v38, 0.0 }
 0x99d   :  { %v2658_v43 = vmax.f32 %v2642_v39, 0.0  ;;  %v3761_v2 = vpop.f32.mrb[76].mxu1  ;;  %3829 = vmatpush3.bf16.msra.mxu1 %v2668_v9 }
 0x99e   :  { %v2670_v57 = vpack.c.bf16 %v2660_v42, %v2659_v40  ;;  %v2615_v52 = vadd.f32 %v3761_v2, %v4638_v32  ;;  %v2578_v15 = vpop.f32.mrb[77].mxu1  ;;  %3830 = vmatprep.subr.bf16.mxu1 %v4196_v25 }
 0x99f   :  { %v2669_v21 = vpack.c.bf16 %v2658_v43, %v2657_v41  ;;  %v2613_v18 = vadd.f32 %v4638_v32, %v2578_v15  ;;  %v3762_v7 = vpop.f32.mrb[78].mxu1 }
 0x9a0   :  { %v2647_v8 = vadd.f32 %v2631_v13, %v2615_v52  ;;  %v2616_v10 = vadd.f32 %v3762_v7, %v4638_v32  ;;  %v2581_v16 = vpop.f32.mrb[79].mxu1 }
 0x9a1   :  { %v2645_v17 = vadd.f32 %v2629_v19, %v2613_v18  ;;  %v2614_v24 = vadd.f32 %v4638_v32, %v2581_v16  ;;  %3832 = vmatpush3.bf16.msra.mxu1 %v2669_v21  ;;  %v4036_v32 = vld [vmem:[#allocation10 + $0x38] sm:$0xff]  }
 0x9a2   :  { %v2648_v23 = vadd.f32 %v2632_v11, %v2616_v10  ;;  %3833 = vmatprep.subr.bf16.mxu1 %v4196_v25  ;;  %v2663_v47 = vmax.f32 %v2647_v8, 0.0  ;;  %3813 = vmatpush3.bf16.msra.mxu0 %v4036_v32 }
 0x9a3   :  { %v2646_v26 = vadd.f32 %v2630_v22, %v2614_v24  ;;  %v2661_v49 = vmax.f32 %v2645_v17, 0.0 }
 0x9a4   :  { %v2664_v48 = vmax.f32 %v2648_v23, 0.0 }
 0x9a5   :  { %v2662_v33 = vmax.f32 %v2646_v26, 0.0  ;;  %3835 = vmatpush3.bf16.msra.mxu1 %v2670_v57 }
 0x9a6   :  { %v2672_v46 = vpack.c.bf16 %v2664_v48, %v2663_v47  ;;  %3836 = vmatprep.subr.bf16.mxu1 %v4196_v25 }
 0x9a7   :  { %v2671_v44 = vpack.c.bf16 %v2662_v33, %v2661_v49 }
 0x9a9   :  { %3838 = vmatpush3.bf16.msra.mxu1 %v2671_v44 }
 0x9aa   :  { %3839 = vmatprep.subr.bf16.mxu1 %v4196_v25 }
 0x9ad   :  { %3841 = vmatpush3.bf16.msra.mxu1 %v2672_v46 }
 0x9b0   :  { %3796 = vmatmul.mubr.f32.vlgmr.msra.gmra.mrb[80].mxu1 %v2673_v1 }
 0xa83   :  { %v2756_v51 = vpop.f32.mrb[80].mxu1 }
 0xa84   :  { %v2760_v54 = vpack.c.bf16 %v2756_v51, %v2756_v51  ;;  %v3797_v36 = vpop.f32.mrb[81].mxu1 }
 0xa86   :  { %3815 = vmatmul.mubr.bf16.vlgmr.msra.gmra.mrb[80].mxu0 %v2760_v54 }
 0xb59   :  { %v2866_v56 = vpop.f32.mrb[80].mxu0 }
 0xb5a   :  { %v2867_v25 = vadd.f32 %v3008_v58, %v2866_v56  ;;  %v3816_v59 = vpop.f32.mrb[81].mxu0 }
 0xb5b   :  { %v2869_v60 = vpop.f32.mrb[82].mxu0 }
 0xb5c   :  { %v3817_v61 = vpop.f32.mrb[83].mxu0  ;;  %v2875_v62 = vsel %vm2874_vm1, %v2867_v25, -1e+30 }
 0xb5d   :  { %2876 = vmax.xlane.f32.xlu0 %v2875_v62 }
 0xbea   :  { %v2877_v63 = vpop.xlane.xlu0 %2876 }
 0xbeb   :  { %v2878_v0 = vsub.f32 %v2875_v62, %v2877_v63 }
 0xbed   :  { %v2879_v3 = vmul.f32 1.442695, %v2878_v0 }
 0xbef   :  { %4037 = vpow2.f32 %v2879_v3 }
 0xbf9   :  { %v4038_v5 = vpop.eup %4037 }
 0xbfa   :  { %2881 = vadd.xlane.f32.xlu0 %v4038_v5 }
 0xc87   :  { %v2882_v6 = vpop.xlane.xlu0 %2881 }
 0xc88   :  { %4039 = vrcp.f32 %v2882_v6 }
 0xc92   :  { %v4040_v9 = vpop.eup %4039 }
 0xc93   :  { %v2884_v45 = vmul.f32 %v4040_v9, %v4038_v5 }
 0xc95   :  { %2885 = vst [vmem:[#allocation11] sm:$0xff] %v2884_v45 }
 0xc96   :  { %4170 = shalt.err (!%p4167_p2)
}
 0xc97   :  { %s4171_s11 = scalar_lea.hbm %s4705_s8, 128 }
 0xc98   :  { %p4172_p3 = scmp.ne.s32.totalorder %s4705_s8, %s4171_s11  ;;  %p4175_p4 = scmp.lt.u32.totalorder %s4171_s11, %s4705_s8 }
 0xc9a   :  { %p4177_p5 = pnand %p4175_p4, %p4172_p3 }
 0xc9c   :  { %4180 = shalt.err (!%p4177_p5)
}
 0xc9d   :  { %2895 = dma.vmem_to_hbm [thread:$0]  %s2893_s0, 128, %s4705_s8, [#allocation4]  }
 0xc9e   :  { %4187 = dma.done.wait [#allocation4], 128  }
 0xc9f   :  { %4188 = vsyncadd [#allocation4], 4294967168 }
 0xca0   :  { %2899 = vsyncpa [#allocation3], 1 }
 0xca1   :  { %2900 = vsyncpa [#allocation6], 1 }
 0xca2   :  { %2901 = vsyncpa [#allocation9], 1 }
 0xca3   :  { %2902 = vsyncpa [#allocation4], 1 }

</bundles_post_ra>
